<compile_context>
chip_gen: v5e
topology: v5e:2x2
jax: 0.10.0
libtpu: 0.0.40
codegen_flags: <defaults>
</compile_context>

<pallas_src>
import functools
import math

import jax
import jax.numpy as jnp
from jax.experimental import pallas as pl
from jax.experimental.pallas import tpu as pltpu

# ----------------------------- config (scaled-down BERT) ---------------------
BATCH = 2
SEQ = 8
HIDDEN = 128          # bert-base: 768
N_HEADS = 2           # bert-base: 12
HEAD_DIM = HIDDEN // N_HEADS
N_LAYERS = 2          # bert-base: 12
INTERMEDIATE = 4 * HIDDEN
VOCAB = 1000
TYPE_VOCAB = 2
MAX_POS = 64
N_CLASSES = 100       # torch.nn.Linear(768, 100)
N_CLASSES_PAD = 128   # lane-dense padded classifier output (sliced to 100 outside)
LN_EPS = 1e-12
TOKENS = BATCH * SEQ


# ----------------------------- in-kernel helpers ------------------------------
def _ln(x, g, b, eps):
    mean = jnp.mean(x, axis=-1, keepdims=True)
    var = jnp.mean((x - mean) ** 2, axis=-1, keepdims=True)
    return (x - mean) * jax.lax.rsqrt(var + eps) * g + b


def _gelu(x):
    # TODO(synk): HF bert-base uses exact erf-GELU; tanh approximation used here.
    return 0.5 * x * (1.0 + jnp.tanh(0.7978845608028654 * (x + 0.044715 * x * x * x)))


# ----------------------------- the single fused kernel ------------------------
def _bert_fused_kernel(emb_ref, bias_ref, emb_g_ref, emb_b_ref,
                       qkv_w_ref, qkv_b_ref, o_w_ref, o_b_ref,
                       ln1_g_ref, ln1_b_ref, ff1_w_ref, ff1_b_ref,
                       ff2_w_ref, ff2_b_ref, ln2_g_ref, ln2_b_ref,
                       pool_w_ref, pool_b_ref, cls_w_ref, cls_b_ref,
                       out_ref, h_scratch,
                       *, batch, seq, n_heads, head_dim, eps):
    layer = pl.program_id(0)
    n_layers = pl.num_programs(0)
    H = n_heads * head_dim
    M = batch * seq

    # ---- first grid step: embedding LayerNorm into the VMEM-resident state ----
    @pl.when(layer == 0)
    def _():
        h_scratch[...] = _ln(emb_ref[...], emb_g_ref[...], emb_b_ref[...], eps)

    h = h_scratch[...]                                          # (M, H) f32

    # ---- fused Q/K/V projection: one (H, 3H) bf16 MXU matmul, f32 acc ----
    qkv = (jnp.dot(h.astype(jnp.bfloat16), qkv_w_ref[...],
                   preferred_element_type=jnp.float32) + qkv_b_ref[...])   # (M, 3H)
    qkv_bf = qkv.astype(jnp.bfloat16)            # cast once (hoisted out of head loop)
    bias_b = bias_ref[...][:, None, :]           # (B, 1, S) additive key mask, hoisted

    scale = 1.0 / math.sqrt(head_dim)

    # ---- attention: static unroll over heads; per-head output-projection
    #      accumulation removes the cross-head lane concat. ----
    # TODO(synk): at SEQ=8 the (B,S,S) score tensor uses 8/128 lanes; a
    # lane-dense packing only pays off at production sequence lengths.
    attn_out = jnp.zeros((M, H), jnp.float32)
    for hh in range(n_heads):
        q_off = hh * head_dim
        k_off = H + hh * head_dim
        v_off = 2 * H + hh * head_dim
        qh = qkv_bf[:, q_off:q_off + head_dim].reshape(batch, seq, head_dim)
        kh = qkv_bf[:, k_off:k_off + head_dim].reshape(batch, seq, head_dim)
        vh = qkv_bf[:, v_off:v_off + head_dim].reshape(batch, seq, head_dim)

        s = jnp.einsum('bqd,bkd->bqk', qh, kh,
                       preferred_element_type=jnp.float32) * scale         # (B, S, S)
        s = s + bias_b                                                      # mask on keys
        m = jnp.max(s, axis=-1, keepdims=True)
        p = jnp.exp(s - m)
        p = p / jnp.sum(p, axis=-1, keepdims=True)                          # exact divide
        ch = jnp.einsum('bqk,bkd->bqd', p.astype(jnp.bfloat16), vh,
                        preferred_element_type=jnp.float32)                 # (B, S, D)
        ch = ch.reshape(M, head_dim)
        # accumulate through the matching row-slab of the output projection
        attn_out = attn_out + jnp.dot(
            ch.astype(jnp.bfloat16),
            o_w_ref[hh * head_dim:(hh + 1) * head_dim, :],
            preferred_element_type=jnp.float32)
    attn_out = attn_out + o_b_ref[...]

    # ---- residual + LayerNorm, FFN (GELU), residual + LayerNorm ----
    h1 = _ln(h + attn_out, ln1_g_ref[...], ln1_b_ref[...], eps)
    ff = (jnp.dot(h1.astype(jnp.bfloat16), ff1_w_ref[...],
                  preferred_element_type=jnp.float32) + ff1_b_ref[...])
    ff = _gelu(ff)
    ff = (jnp.dot(ff.astype(jnp.bfloat16), ff2_w_ref[...],
                  preferred_element_type=jnp.float32) + ff2_b_ref[...])
    h2 = _ln(h1 + ff, ln2_g_ref[...], ln2_b_ref[...], eps)
    h_scratch[...] = h2

    # ---- last grid step: pooler(tanh) + classifier on the CLS rows, fused ----
    @pl.when(layer == n_layers - 1)
    def _():
        cls = h2.reshape(batch, seq, H)[:, 0, :]                            # (B, H)
        pooled = jnp.tanh(jnp.dot(cls.astype(jnp.bfloat16), pool_w_ref[...],
                                  preferred_element_type=jnp.float32) + pool_b_ref[...])
        # Dropout(0.3) is identity at inference.
        logits = (jnp.dot(pooled.astype(jnp.bfloat16), cls_w_ref[...],
                          preferred_element_type=jnp.float32) + cls_b_ref[...])
        out_ref[...] = logits.astype(out_ref.dtype)


def bert_forward_fused(emb, bias, params):
    """One pallas_call for LN(emb) + N_LAYERS encoder layers + pooler/classifier."""
    M, H = emb.shape
    kernel = functools.partial(_bert_fused_kernel, batch=BATCH, seq=SEQ,
                               n_heads=N_HEADS, head_dim=HEAD_DIM, eps=LN_EPS)

    def rep(shape):                 # grid-invariant block (stays VMEM resident)
        nd = len(shape)
        return pl.BlockSpec(shape, lambda l, _nd=nd: (0,) * _nd)

    def per_layer(shape_tail):      # stream layer l's slab, squeeze the layer dim
        nd = len(shape_tail)
        return pl.BlockSpec((None,) + shape_tail,
                            lambda l, _nd=nd: (l,) + (0,) * _nd)

    grid_spec = pltpu.PrefetchScalarGridSpec(
        num_scalar_prefetch=0,
        grid=(N_LAYERS,),
        in_specs=[
            rep((M, H)),                          # summed embeddings
            rep((BATCH, SEQ)),                    # additive attention-mask bias
            rep((1, H)), rep((1, H)),             # embedding LayerNorm
            per_layer((H, 3 * H)), per_layer((1, 3 * H)),               # QKV
            per_layer((H, H)), per_layer((1, H)),                       # attn out proj
            per_layer((1, H)), per_layer((1, H)),                       # LN1
            per_layer((H, INTERMEDIATE)), per_layer((1, INTERMEDIATE)), # FF1
            per_layer((INTERMEDIATE, H)), per_layer((1, H)),            # FF2
            per_layer((1, H)), per_layer((1, H)),                       # LN2
            rep((H, H)), rep((1, H)),                                   # pooler
            rep((H, N_CLASSES_PAD)), rep((1, N_CLASSES_PAD)),           # classifier (padded)
        ],
        out_specs=pl.BlockSpec((BATCH, N_CLASSES_PAD), lambda l: (0, 0)),
        scratch_shapes=[pltpu.VMEM((M, H), jnp.float32)],               # resident activations
    )

    return pl.pallas_call(
        kernel,
        grid_spec=grid_spec,
        out_shape=jax.ShapeDtypeStruct((BATCH, N_CLASSES_PAD), jnp.float32),
        compiler_params=pltpu.CompilerParams(
            # layer axis carries the activation recurrence -> must be arbitrary
            dimension_semantics=("arbitrary",)),
    )(emb, bias,
      params["emb_ln_g"], params["emb_ln_b"],
      params["qkv_w"], params["qkv_b"],
      params["o_w"], params["o_b"],
      params["ln1_g"], params["ln1_b"],
      params["ff1_w"], params["ff1_b"],
      params["ff2_w"], params["ff2_b"],
      params["ln2_g"], params["ln2_b"],
      params["pooler_w"], params["pooler_b"],
      params["cls_w_pad"], params["cls_b_pad"])


# ----------------------------- parameter init --------------------------------
def init_params(key):
    std = 0.02
    keys = iter(jax.random.split(key, 64))

    def dense(shape, dtype=jnp.bfloat16):
        # MXU-facing weights stored in bf16; element-wise params stay f32.
        return (jax.random.normal(next(keys), shape, jnp.float32) * std).astype(dtype)

    # classifier weight padded to a lane-dense 128 columns (zeros in the pad)
    cls_w = jax.random.normal(next(keys), (HIDDEN, N_CLASSES), jnp.float32) * std
    cls_w_pad = jnp.zeros((HIDDEN, N_CLASSES_PAD), jnp.float32).at[:, :N_CLASSES].set(cls_w)

    return {
        "word_emb": dense((VOCAB, HIDDEN), jnp.float32),
        "pos_emb": dense((MAX_POS, HIDDEN), jnp.float32),
        "type_emb": dense((TYPE_VOCAB, HIDDEN), jnp.float32),
        "emb_ln_g": jnp.ones((1, HIDDEN), jnp.float32),
        "emb_ln_b": jnp.zeros((1, HIDDEN), jnp.float32),
        # per-layer weights stacked along a leading layer axis (fed to the layer grid)
        "qkv_w": dense((N_LAYERS, HIDDEN, 3 * HIDDEN)),
        "qkv_b": jnp.zeros((N_LAYERS, 1, 3 * HIDDEN), jnp.float32),
        "o_w": dense((N_LAYERS, HIDDEN, HIDDEN)),
        "o_b": jnp.zeros((N_LAYERS, 1, HIDDEN), jnp.float32),
        "ln1_g": jnp.ones((N_LAYERS, 1, HIDDEN), jnp.float32),
        "ln1_b": jnp.zeros((N_LAYERS, 1, HIDDEN), jnp.float32),
        "ff1_w": dense((N_LAYERS, HIDDEN, INTERMEDIATE)),
        "ff1_b": jnp.zeros((N_LAYERS, 1, INTERMEDIATE), jnp.float32),
        "ff2_w": dense((N_LAYERS, INTERMEDIATE, HIDDEN)),
        "ff2_b": jnp.zeros((N_LAYERS, 1, HIDDEN), jnp.float32),
        "ln2_g": jnp.ones((N_LAYERS, 1, HIDDEN), jnp.float32),
        "ln2_b": jnp.zeros((N_LAYERS, 1, HIDDEN), jnp.float32),
        "pooler_w": dense((HIDDEN, HIDDEN)),
        "pooler_b": jnp.zeros((1, HIDDEN), jnp.float32),
        "cls_w_pad": cls_w_pad.astype(jnp.bfloat16),
        "cls_b_pad": jnp.zeros((1, N_CLASSES_PAD), jnp.float32),
    }


# ----------------------------- forward pass ----------------------------------
def bert_class_forward(params, ids, mask, token_type_ids):
    B, S = ids.shape

    # embeddings (gathers stay in XLA); everything after is ONE fused pallas_call
    emb = (jnp.take(params["word_emb"], ids, axis=0)
           + params["pos_emb"][:S][None, :, :]
           + jnp.take(params["type_emb"], token_type_ids, axis=0))          # (B, S, H)
    emb = emb.reshape(B * S, HIDDEN)

    # additive attention-mask bias, shared by all heads: (B, S) f32
    bias = (1.0 - mask.astype(jnp.float32)) * -10000.0

    logits_pad = bert_forward_fused(emb, bias, params)                      # (B, 128)
    return logits_pad[:, :N_CLASSES]                                        # (B, 100)


# ----------------------------- main -------------------------------------------
if __name__ == "__main__":
    key = jax.random.PRNGKey(0)
    k_param, k_ids, k_type = jax.random.split(key, 3)

    params = init_params(k_param)

    ids = jax.random.randint(k_ids, (BATCH, SEQ), 0, VOCAB, dtype=jnp.int32)
    token_type_ids = jax.random.randint(k_type, (BATCH, SEQ), 0, TYPE_VOCAB, dtype=jnp.int32)
    # attention mask: batch 1 has two padded positions
    mask = jnp.ones((BATCH, SEQ), jnp.int32).at[1, -2:].set(0)

    fwd = jax.jit(bert_class_forward)
    out = jax.block_until_ready(fwd(params, ids, mask, token_type_ids))
    assert out.shape == (BATCH, N_CLASSES) and out.dtype == jnp.float32
    assert bool(jnp.all(jnp.isfinite(out)))
    print("KERNEL_OK")
</pallas_src>

<mosaic_0001>
module attributes {stable_mosaic.version = 11 : i64} {
  func.func @_bert_fused_kernel(%arg0: i32, %arg1: memref<16x128xf32, #tpu.memory_space<vmem>>, %arg2: memref<2x8xf32, #tpu.memory_space<vmem>>, %arg3: memref<1x128xf32, #tpu.memory_space<vmem>>, %arg4: memref<1x128xf32, #tpu.memory_space<vmem>>, %arg5: memref<1x128x384xbf16, #tpu.memory_space<vmem>>, %arg6: memref<1x1x384xf32, #tpu.memory_space<vmem>>, %arg7: memref<1x128x128xbf16, #tpu.memory_space<vmem>>, %arg8: memref<1x1x128xf32, #tpu.memory_space<vmem>>, %arg9: memref<1x1x128xf32, #tpu.memory_space<vmem>>, %arg10: memref<1x1x128xf32, #tpu.memory_space<vmem>>, %arg11: memref<1x128x512xbf16, #tpu.memory_space<vmem>>, %arg12: memref<1x1x512xf32, #tpu.memory_space<vmem>>, %arg13: memref<1x512x128xbf16, #tpu.memory_space<vmem>>, %arg14: memref<1x1x128xf32, #tpu.memory_space<vmem>>, %arg15: memref<1x1x128xf32, #tpu.memory_space<vmem>>, %arg16: memref<1x1x128xf32, #tpu.memory_space<vmem>>, %arg17: memref<128x128xbf16, #tpu.memory_space<vmem>>, %arg18: memref<1x128xf32, #tpu.memory_space<vmem>>, %arg19: memref<128x128xbf16, #tpu.memory_space<vmem>>, %arg20: memref<1x128xf32, #tpu.memory_space<vmem>>, %arg21: memref<2x128xf32, #tpu.memory_space<vmem>>, %arg22: memref<16x128xf32, #tpu.memory_space<vmem>>) attributes {dimension_semantics = [#tpu.dimension_semantics<arbitrary>], iteration_bounds = array<i64: 2>, scalar_prefetch = 0 : i64, scratch_operands = 1 : i64, tpu.core_type = #tpu.core_type<tc>, window_params = [{pipeline_mode = #tpu.pipeline_mode<synchronous>, transform_indices = @transform_0, window_bounds = array<i64: 16, 128>}, {pipeline_mode = #tpu.pipeline_mode<synchronous>, transform_indices = @transform_1, window_bounds = array<i64: 2, 8>}, {pipeline_mode = #tpu.pipeline_mode<synchronous>, transform_indices = @transform_2, window_bounds = array<i64: 1, 128>}, {pipeline_mode = #tpu.pipeline_mode<synchronous>, transform_indices = @transform_3, window_bounds = array<i64: 1, 128>}, {transform_indices = @transform_4, window_bounds = array<i64: 1, 128, 384>}, {transform_indices = @transform_5, window_bounds = array<i64: 1, 1, 384>}, {transform_indices = @transform_6, window_bounds = array<i64: 1, 128, 128>}, {transform_indices = @transform_7, window_bounds = array<i64: 1, 1, 128>}, {transform_indices = @transform_8, window_bounds = array<i64: 1, 1, 128>}, {transform_indices = @transform_9, window_bounds = array<i64: 1, 1, 128>}, {transform_indices = @transform_10, window_bounds = array<i64: 1, 128, 512>}, {transform_indices = @transform_11, window_bounds = array<i64: 1, 1, 512>}, {transform_indices = @transform_12, window_bounds = array<i64: 1, 512, 128>}, {transform_indices = @transform_13, window_bounds = array<i64: 1, 1, 128>}, {transform_indices = @transform_14, window_bounds = array<i64: 1, 1, 128>}, {transform_indices = @transform_15, window_bounds = array<i64: 1, 1, 128>}, {pipeline_mode = #tpu.pipeline_mode<synchronous>, transform_indices = @transform_16, window_bounds = array<i64: 128, 128>}, {pipeline_mode = #tpu.pipeline_mode<synchronous>, transform_indices = @transform_17, window_bounds = array<i64: 1, 128>}, {pipeline_mode = #tpu.pipeline_mode<synchronous>, transform_indices = @transform_18, window_bounds = array<i64: 128, 128>}, {pipeline_mode = #tpu.pipeline_mode<synchronous>, transform_indices = @transform_19, window_bounds = array<i64: 1, 128>}, {pipeline_mode = #tpu.pipeline_mode<synchronous>, transform_indices = @transform_20, window_bounds = array<i64: 2, 128>}]} {
    %c0_i32 = arith.constant 0 : i32
    %0 = arith.cmpi eq, %arg0, %c0_i32 : i32
    %1 = arith.extui %0 : i1 to i32
    %c0_i32_0 = arith.constant 0 : i32
    %2 = arith.cmpi ne, %1, %c0_i32_0 : i32
    scf.if %2 {
      %c0_74 = arith.constant 0 : index
      %c0_75 = arith.constant 0 : index
      %163 = vector.load %arg1[%c0_74, %c0_75] : memref<16x128xf32, #tpu.memory_space<vmem>>, vector<16x128xf32>
      %c0_76 = arith.constant 0 : index
      %c0_77 = arith.constant 0 : index
      %164 = vector.load %arg3[%c0_76, %c0_77] : memref<1x128xf32, #tpu.memory_space<vmem>>, vector<1x128xf32>
      %c0_78 = arith.constant 0 : index
      %c0_79 = arith.constant 0 : index
      %165 = vector.load %arg4[%c0_78, %c0_79] : memref<1x128xf32, #tpu.memory_space<vmem>>, vector<1x128xf32>
      %cst_80 = arith.constant dense<0.000000e+00> : vector<16xf32>
      %166 = vector.multi_reduction <add>, %163, %cst_80 [1] : vector<16x128xf32> to vector<16xf32>
      %167 = vector.shape_cast %166 : vector<16xf32> to vector<16x1xf32>
      %cst_81 = arith.constant 1.280000e+02 : f32
      %168 = vector.broadcast %cst_81 : f32 to vector<16x1xf32>
      %169 = arith.divf %167, %168 : vector<16x1xf32>
      %170 = vector.broadcast %169 : vector<16x1xf32> to vector<16x128xf32>
      %171 = arith.subf %163, %170 : vector<16x128xf32>
      %172 = arith.mulf %171, %171 : vector<16x128xf32>
      %cst_82 = arith.constant dense<0.000000e+00> : vector<16xf32>
      %173 = vector.multi_reduction <add>, %172, %cst_82 [1] : vector<16x128xf32> to vector<16xf32>
      %174 = vector.shape_cast %173 : vector<16xf32> to vector<16x1xf32>
      %cst_83 = arith.constant 1.280000e+02 : f32
      %175 = vector.broadcast %cst_83 : f32 to vector<16x1xf32>
      %176 = arith.divf %174, %175 : vector<16x1xf32>
      %177 = vector.broadcast %169 : vector<16x1xf32> to vector<16x128xf32>
      %178 = arith.subf %163, %177 : vector<16x128xf32>
      %cst_84 = arith.constant 9.99999996E-13 : f32
      %179 = vector.broadcast %cst_84 : f32 to vector<16x1xf32>
      %180 = arith.addf %176, %179 : vector<16x1xf32>
      %181 = math.rsqrt %180 : vector<16x1xf32>
      %182 = vector.broadcast %181 : vector<16x1xf32> to vector<16x128xf32>
      %183 = arith.mulf %178, %182 : vector<16x128xf32>
      %184 = vector.broadcast %164 : vector<1x128xf32> to vector<16x128xf32>
      %185 = arith.mulf %183, %184 : vector<16x128xf32>
      %186 = vector.broadcast %165 : vector<1x128xf32> to vector<16x128xf32>
      %187 = arith.addf %185, %186 : vector<16x128xf32>
      %c0_85 = arith.constant 0 : index
      %c0_86 = arith.constant 0 : index
      %188 = vector.load %arg22[%c0_85, %c0_86] : memref<16x128xf32, #tpu.memory_space<vmem>>, vector<16x128xf32>
      tpu.vector_store %arg22[%c0_85, %c0_86], %187 {strides = array<i32>} : memref<16x128xf32, #tpu.memory_space<vmem>>, vector<16x128xf32>,
    } else {
    }
    %c0 = arith.constant 0 : index
    %c0_1 = arith.constant 0 : index
    %3 = vector.load %arg22[%c0, %c0_1] : memref<16x128xf32, #tpu.memory_space<vmem>>, vector<16x128xf32>
    %4 = arith.truncf %3 : vector<16x128xf32> to vector<16x128xbf16>
    %c0_2 = arith.constant 0 : index
    %c0_3 = arith.constant 0 : index
    %c0_4 = arith.constant 0 : index
    %5 = vector.load %arg5[%c0_2, %c0_3, %c0_4] : memref<1x128x384xbf16, #tpu.memory_space<vmem>>, vector<1x128x384xbf16>
    %6 = vector.shape_cast %5 : vector<1x128x384xbf16> to vector<128x384xbf16>
    %cst = arith.constant dense<0.000000e+00> : vector<16x384xf32>
    %7 = tpu.matmul %4, %6, %cst {dimension_numbers = #tpu.dot_dimension_numbers<[1], [0], [0], [1], [0, 0, 1, 1], [], []>} : vector<16x128xbf16>, vector<128x384xbf16>, vector<16x384xf32> -> vector<16x384xf32>
    %c0_5 = arith.constant 0 : index
    %c0_6 = arith.constant 0 : index
    %c0_7 = arith.constant 0 : index
    %8 = vector.load %arg6[%c0_5, %c0_6, %c0_7] : memref<1x1x384xf32, #tpu.memory_space<vmem>>, vector<1x1x384xf32>
    %9 = vector.shape_cast %8 : vector<1x1x384xf32> to vector<1x384xf32>
    %10 = vector.broadcast %9 : vector<1x384xf32> to vector<16x384xf32>
    %11 = arith.addf %7, %10 : vector<16x384xf32>
    %12 = arith.truncf %11 : vector<16x384xf32> to vector<16x384xbf16>
    %c0_8 = arith.constant 0 : index
    %c0_9 = arith.constant 0 : index
    %13 = vector.load %arg2[%c0_8, %c0_9] : memref<2x8xf32, #tpu.memory_space<vmem>>, vector<2x8xf32>
    %14 = vector.shape_cast %13 : vector<2x8xf32> to vector<2x1x8xf32>
    %cst_10 = arith.constant 0.000000e+00 : f32
    %15 = vector.broadcast %cst_10 : f32 to vector<16x128xf32>
    %16 = vector.extract_strided_slice %12 {offsets = [0, 0], sizes = [16, 64], strides = [1, 1]} : vector<16x384xbf16> to vector<16x64xbf16>
    %17 = vector.shape_cast %16 : vector<16x64xbf16> to vector<2x8x64xbf16>
    %18 = vector.extract_strided_slice %12 {offsets = [0, 128], sizes = [16, 64], strides = [1, 1]} : vector<16x384xbf16> to vector<16x64xbf16>
    %19 = vector.shape_cast %18 : vector<16x64xbf16> to vector<2x8x64xbf16>
    %20 = vector.extract_strided_slice %12 {offsets = [0, 256], sizes = [16, 64], strides = [1, 1]} : vector<16x384xbf16> to vector<16x64xbf16>
    %21 = vector.shape_cast %20 : vector<16x64xbf16> to vector<2x8x64xbf16>
    "tpu.trace_start"() <{level = 10 : i32, message = "bqd,bkd->bqk"}> : () -> ()
    %cst_11 = arith.constant dense<0.000000e+00> : vector<2x8x8xf32>
    %22 = tpu.matmul %17, %19, %cst_11 {dimension_numbers = #tpu.dot_dimension_numbers<[2], [2], [1], [1], [0, 0, 0, 1, 1, 1], [0], [0]>} : vector<2x8x64xbf16>, vector<2x8x64xbf16>, vector<2x8x8xf32> -> vector<2x8x8xf32>
    "tpu.trace_stop"() : () -> ()
    %cst_12 = arith.constant 1.250000e-01 : f32
    %23 = vector.broadcast %cst_12 : f32 to vector<2x8x8xf32>
    %24 = arith.mulf %22, %23 : vector<2x8x8xf32>
    %25 = vector.broadcast %14 : vector<2x1x8xf32> to vector<2x8x8xf32>
    %26 = arith.addf %24, %25 : vector<2x8x8xf32>
    %cst_13 = arith.constant dense<0xFF800000> : vector<2x8xf32>
    %27 = vector.multi_reduction <maximumf>, %26, %cst_13 [2] : vector<2x8x8xf32> to vector<2x8xf32>
    %28 = vector.shape_cast %27 : vector<2x8xf32> to vector<2x8x1xf32>
    %29 = vector.broadcast %28 : vector<2x8x1xf32> to vector<2x8x8xf32>
    %30 = arith.subf %26, %29 : vector<2x8x8xf32>
    %31 = math.exp %30 : vector<2x8x8xf32>
    %cst_14 = arith.constant dense<0.000000e+00> : vector<2x8xf32>
    %32 = vector.multi_reduction <add>, %31, %cst_14 [2] : vector<2x8x8xf32> to vector<2x8xf32>
    %33 = vector.shape_cast %32 : vector<2x8xf32> to vector<2x8x1xf32>
    %34 = vector.broadcast %33 : vector<2x8x1xf32> to vector<2x8x8xf32>
    %35 = arith.divf %31, %34 : vector<2x8x8xf32>
    %36 = arith.truncf %35 : vector<2x8x8xf32> to vector<2x8x8xbf16>
    "tpu.trace_start"() <{level = 10 : i32, message = "bqk,bkd->bqd"}> : () -> ()
    %cst_15 = arith.constant dense<0.000000e+00> : vector<2x8x64xf32>
    %37 = tpu.matmul %36, %21, %cst_15 {dimension_numbers = #tpu.dot_dimension_numbers<[2], [1], [1], [2], [0, 0, 0, 1, 1, 2], [0], [0]>} : vector<2x8x8xbf16>, vector<2x8x64xbf16>, vector<2x8x64xf32> -> vector<2x8x64xf32>
    "tpu.trace_stop"() : () -> ()
    %38 = vector.shape_cast %37 : vector<2x8x64xf32> to vector<16x64xf32>
    %39 = arith.truncf %38 : vector<16x64xf32> to vector<16x64xbf16>
    %c0_16 = arith.constant 0 : index
    %c0_17 = arith.constant 0 : index
    %c0_18 = arith.constant 0 : index
    %40 = vector.load %arg7[%c0_16, %c0_17, %c0_18] : memref<1x128x128xbf16, #tpu.memory_space<vmem>>, vector<1x64x128xbf16>
    %41 = vector.shape_cast %40 : vector<1x64x128xbf16> to vector<64x128xbf16>
    %cst_19 = arith.constant dense<0.000000e+00> : vector<16x128xf32>
    %42 = tpu.matmul %39, %41, %cst_19 {dimension_numbers = #tpu.dot_dimension_numbers<[1], [0], [0], [1], [0, 0, 1, 1], [], []>} : vector<16x64xbf16>, vector<64x128xbf16>, vector<16x128xf32> -> vector<16x128xf32>
    %43 = arith.addf %15, %42 : vector<16x128xf32>
    %44 = vector.extract_strided_slice %12 {offsets = [0, 64], sizes = [16, 64], strides = [1, 1]} : vector<16x384xbf16> to vector<16x64xbf16>
    %45 = vector.shape_cast %44 : vector<16x64xbf16> to vector<2x8x64xbf16>
    %46 = vector.extract_strided_slice %12 {offsets = [0, 192], sizes = [16, 64], strides = [1, 1]} : vector<16x384xbf16> to vector<16x64xbf16>
    %47 = vector.shape_cast %46 : vector<16x64xbf16> to vector<2x8x64xbf16>
    %48 = vector.extract_strided_slice %12 {offsets = [0, 320], sizes = [16, 64], strides = [1, 1]} : vector<16x384xbf16> to vector<16x64xbf16>
    %49 = vector.shape_cast %48 : vector<16x64xbf16> to vector<2x8x64xbf16>
    "tpu.trace_start"() <{level = 10 : i32, message = "bqd,bkd->bqk"}> : () -> ()
    %cst_20 = arith.constant dense<0.000000e+00> : vector<2x8x8xf32>
    %50 = tpu.matmul %45, %47, %cst_20 {dimension_numbers = #tpu.dot_dimension_numbers<[2], [2], [1], [1], [0, 0, 0, 1, 1, 1], [0], [0]>} : vector<2x8x64xbf16>, vector<2x8x64xbf16>, vector<2x8x8xf32> -> vector<2x8x8xf32>
    "tpu.trace_stop"() : () -> ()
    %cst_21 = arith.constant 1.250000e-01 : f32
    %51 = vector.broadcast %cst_21 : f32 to vector<2x8x8xf32>
    %52 = arith.mulf %50, %51 : vector<2x8x8xf32>
    %53 = vector.broadcast %14 : vector<2x1x8xf32> to vector<2x8x8xf32>
    %54 = arith.addf %52, %53 : vector<2x8x8xf32>
    %cst_22 = arith.constant dense<0xFF800000> : vector<2x8xf32>
    %55 = vector.multi_reduction <maximumf>, %54, %cst_22 [2] : vector<2x8x8xf32> to vector<2x8xf32>
    %56 = vector.shape_cast %55 : vector<2x8xf32> to vector<2x8x1xf32>
    %57 = vector.broadcast %56 : vector<2x8x1xf32> to vector<2x8x8xf32>
    %58 = arith.subf %54, %57 : vector<2x8x8xf32>
    %59 = math.exp %58 : vector<2x8x8xf32>
    %cst_23 = arith.constant dense<0.000000e+00> : vector<2x8xf32>
    %60 = vector.multi_reduction <add>, %59, %cst_23 [2] : vector<2x8x8xf32> to vector<2x8xf32>
    %61 = vector.shape_cast %60 : vector<2x8xf32> to vector<2x8x1xf32>
    %62 = vector.broadcast %61 : vector<2x8x1xf32> to vector<2x8x8xf32>
    %63 = arith.divf %59, %62 : vector<2x8x8xf32>
    %64 = arith.truncf %63 : vector<2x8x8xf32> to vector<2x8x8xbf16>
    "tpu.trace_start"() <{level = 10 : i32, message = "bqk,bkd->bqd"}> : () -> ()
    %cst_24 = arith.constant dense<0.000000e+00> : vector<2x8x64xf32>
    %65 = tpu.matmul %64, %49, %cst_24 {dimension_numbers = #tpu.dot_dimension_numbers<[2], [1], [1], [2], [0, 0, 0, 1, 1, 2], [0], [0]>} : vector<2x8x8xbf16>, vector<2x8x64xbf16>, vector<2x8x64xf32> -> vector<2x8x64xf32>
    "tpu.trace_stop"() : () -> ()
    %66 = vector.shape_cast %65 : vector<2x8x64xf32> to vector<16x64xf32>
    %67 = arith.truncf %66 : vector<16x64xf32> to vector<16x64xbf16>
    %c0_25 = arith.constant 0 : index
    %c64 = arith.constant 64 : index
    %c0_26 = arith.constant 0 : index
    %68 = vector.load %arg7[%c0_25, %c64, %c0_26] : memref<1x128x128xbf16, #tpu.memory_space<vmem>>, vector<1x64x128xbf16>
    %69 = vector.shape_cast %68 : vector<1x64x128xbf16> to vector<64x128xbf16>
    %cst_27 = arith.constant dense<0.000000e+00> : vector<16x128xf32>
    %70 = tpu.matmul %67, %69, %cst_27 {dimension_numbers = #tpu.dot_dimension_numbers<[1], [0], [0], [1], [0, 0, 1, 1], [], []>} : vector<16x64xbf16>, vector<64x128xbf16>, vector<16x128xf32> -> vector<16x128xf32>
    %71 = arith.addf %43, %70 : vector<16x128xf32>
    %c0_28 = arith.constant 0 : index
    %c0_29 = arith.constant 0 : index
    %c0_30 = arith.constant 0 : index
    %72 = vector.load %arg8[%c0_28, %c0_29, %c0_30] : memref<1x1x128xf32, #tpu.memory_space<vmem>>, vector<1x1x128xf32>
    %73 = vector.shape_cast %72 : vector<1x1x128xf32> to vector<1x128xf32>
    %74 = vector.broadcast %73 : vector<1x128xf32> to vector<16x128xf32>
    %75 = arith.addf %71, %74 : vector<16x128xf32>
    %76 = arith.addf %3, %75 : vector<16x128xf32>
    %c0_31 = arith.constant 0 : index
    %c0_32 = arith.constant 0 : index
    %c0_33 = arith.constant 0 : index
    %77 = vector.load %arg9[%c0_31, %c0_32, %c0_33] : memref<1x1x128xf32, #tpu.memory_space<vmem>>, vector<1x1x128xf32>
    %78 = vector.shape_cast %77 : vector<1x1x128xf32> to vector<1x128xf32>
    %c0_34 = arith.constant 0 : index
    %c0_35 = arith.constant 0 : index
    %c0_36 = arith.constant 0 : index
    %79 = vector.load %arg10[%c0_34, %c0_35, %c0_36] : memref<1x1x128xf32, #tpu.memory_space<vmem>>, vector<1x1x128xf32>
    %80 = vector.shape_cast %79 : vector<1x1x128xf32> to vector<1x128xf32>
    %cst_37 = arith.constant dense<0.000000e+00> : vector<16xf32>
    %81 = vector.multi_reduction <add>, %76, %cst_37 [1] : vector<16x128xf32> to vector<16xf32>
    %82 = vector.shape_cast %81 : vector<16xf32> to vector<16x1xf32>
    %cst_38 = arith.constant 1.280000e+02 : f32
    %83 = vector.broadcast %cst_38 : f32 to vector<16x1xf32>
    %84 = arith.divf %82, %83 : vector<16x1xf32>
    %85 = vector.broadcast %84 : vector<16x1xf32> to vector<16x128xf32>
    %86 = arith.subf %76, %85 : vector<16x128xf32>
    %87 = arith.mulf %86, %86 : vector<16x128xf32>
    %cst_39 = arith.constant dense<0.000000e+00> : vector<16xf32>
    %88 = vector.multi_reduction <add>, %87, %cst_39 [1] : vector<16x128xf32> to vector<16xf32>
    %89 = vector.shape_cast %88 : vector<16xf32> to vector<16x1xf32>
    %cst_40 = arith.constant 1.280000e+02 : f32
    %90 = vector.broadcast %cst_40 : f32 to vector<16x1xf32>
    %91 = arith.divf %89, %90 : vector<16x1xf32>
    %92 = vector.broadcast %84 : vector<16x1xf32> to vector<16x128xf32>
    %93 = arith.subf %76, %92 : vector<16x128xf32>
    %cst_41 = arith.constant 9.99999996E-13 : f32
    %94 = vector.broadcast %cst_41 : f32 to vector<16x1xf32>
    %95 = arith.addf %91, %94 : vector<16x1xf32>
    %96 = math.rsqrt %95 : vector<16x1xf32>
    %97 = vector.broadcast %96 : vector<16x1xf32> to vector<16x128xf32>
    %98 = arith.mulf %93, %97 : vector<16x128xf32>
    %99 = vector.broadcast %78 : vector<1x128xf32> to vector<16x128xf32>
    %100 = arith.mulf %98, %99 : vector<16x128xf32>
    %101 = vector.broadcast %80 : vector<1x128xf32> to vector<16x128xf32>
    %102 = arith.addf %100, %101 : vector<16x128xf32>
    %103 = arith.truncf %102 : vector<16x128xf32> to vector<16x128xbf16>
    %c0_42 = arith.constant 0 : index
    %c0_43 = arith.constant 0 : index
    %c0_44 = arith.constant 0 : index
    %104 = vector.load %arg11[%c0_42, %c0_43, %c0_44] : memref<1x128x512xbf16, #tpu.memory_space<vmem>>, vector<1x128x512xbf16>
    %105 = vector.shape_cast %104 : vector<1x128x512xbf16> to vector<128x512xbf16>
    %cst_45 = arith.constant dense<0.000000e+00> : vector<16x512xf32>
    %106 = tpu.matmul %103, %105, %cst_45 {dimension_numbers = #tpu.dot_dimension_numbers<[1], [0], [0], [1], [0, 0, 1, 1], [], []>} : vector<16x128xbf16>, vector<128x512xbf16>, vector<16x512xf32> -> vector<16x512xf32>
    %c0_46 = arith.constant 0 : index
    %c0_47 = arith.constant 0 : index
    %c0_48 = arith.constant 0 : index
    %107 = vector.load %arg12[%c0_46, %c0_47, %c0_48] : memref<1x1x512xf32, #tpu.memory_space<vmem>>, vector<1x1x512xf32>
    %108 = vector.shape_cast %107 : vector<1x1x512xf32> to vector<1x512xf32>
    %109 = vector.broadcast %108 : vector<1x512xf32> to vector<16x512xf32>
    %110 = arith.addf %106, %109 : vector<16x512xf32>
    %cst_49 = arith.constant 5.000000e-01 : f32
    %111 = vector.broadcast %cst_49 : f32 to vector<16x512xf32>
    %112 = arith.mulf %111, %110 : vector<16x512xf32>
    %cst_50 = arith.constant 4.471500e-02 : f32
    %113 = vector.broadcast %cst_50 : f32 to vector<16x512xf32>
    %114 = arith.mulf %113, %110 : vector<16x512xf32>
    %115 = arith.mulf %114, %110 : vector<16x512xf32>
    %116 = arith.mulf %115, %110 : vector<16x512xf32>
    %117 = arith.addf %110, %116 : vector<16x512xf32>
    %cst_51 = arith.constant 0.797884583 : f32
    %118 = vector.broadcast %cst_51 : f32 to vector<16x512xf32>
    %119 = arith.mulf %118, %117 : vector<16x512xf32>
    %120 = math.tanh %119 : vector<16x512xf32>
    %cst_52 = arith.constant 1.000000e+00 : f32
    %121 = vector.broadcast %cst_52 : f32 to vector<16x512xf32>
    %122 = arith.addf %121, %120 : vector<16x512xf32>
    %123 = arith.mulf %112, %122 : vector<16x512xf32>
    %124 = arith.truncf %123 : vector<16x512xf32> to vector<16x512xbf16>
    %c0_53 = arith.constant 0 : index
    %c0_54 = arith.constant 0 : index
    %c0_55 = arith.constant 0 : index
    %125 = vector.load %arg13[%c0_53, %c0_54, %c0_55] : memref<1x512x128xbf16, #tpu.memory_space<vmem>>, vector<1x512x128xbf16>
    %126 = vector.shape_cast %125 : vector<1x512x128xbf16> to vector<512x128xbf16>
    %cst_56 = arith.constant dense<0.000000e+00> : vector<16x128xf32>
    %127 = tpu.matmul %124, %126, %cst_56 {dimension_numbers = #tpu.dot_dimension_numbers<[1], [0], [0], [1], [0, 0, 1, 1], [], []>} : vector<16x512xbf16>, vector<512x128xbf16>, vector<16x128xf32> -> vector<16x128xf32>
    %c0_57 = arith.constant 0 : index
    %c0_58 = arith.constant 0 : index
    %c0_59 = arith.constant 0 : index
    %128 = vector.load %arg14[%c0_57, %c0_58, %c0_59] : memref<1x1x128xf32, #tpu.memory_space<vmem>>, vector<1x1x128xf32>
    %129 = vector.shape_cast %128 : vector<1x1x128xf32> to vector<1x128xf32>
    %130 = vector.broadcast %129 : vector<1x128xf32> to vector<16x128xf32>
    %131 = arith.addf %127, %130 : vector<16x128xf32>
    %132 = arith.addf %102, %131 : vector<16x128xf32>
    %c0_60 = arith.constant 0 : index
    %c0_61 = arith.constant 0 : index
    %c0_62 = arith.constant 0 : index
    %133 = vector.load %arg15[%c0_60, %c0_61, %c0_62] : memref<1x1x128xf32, #tpu.memory_space<vmem>>, vector<1x1x128xf32>
    %134 = vector.shape_cast %133 : vector<1x1x128xf32> to vector<1x128xf32>
    %c0_63 = arith.constant 0 : index
    %c0_64 = arith.constant 0 : index
    %c0_65 = arith.constant 0 : index
    %135 = vector.load %arg16[%c0_63, %c0_64, %c0_65] : memref<1x1x128xf32, #tpu.memory_space<vmem>>, vector<1x1x128xf32>
    %136 = vector.shape_cast %135 : vector<1x1x128xf32> to vector<1x128xf32>
    %cst_66 = arith.constant dense<0.000000e+00> : vector<16xf32>
    %137 = vector.multi_reduction <add>, %132, %cst_66 [1] : vector<16x128xf32> to vector<16xf32>
    %138 = vector.shape_cast %137 : vector<16xf32> to vector<16x1xf32>
    %cst_67 = arith.constant 1.280000e+02 : f32
    %139 = vector.broadcast %cst_67 : f32 to vector<16x1xf32>
    %140 = arith.divf %138, %139 : vector<16x1xf32>
    %141 = vector.broadcast %140 : vector<16x1xf32> to vector<16x128xf32>
    %142 = arith.subf %132, %141 : vector<16x128xf32>
    %143 = arith.mulf %142, %142 : vector<16x128xf32>
    %cst_68 = arith.constant dense<0.000000e+00> : vector<16xf32>
    %144 = vector.multi_reduction <add>, %143, %cst_68 [1] : vector<16x128xf32> to vector<16xf32>
    %145 = vector.shape_cast %144 : vector<16xf32> to vector<16x1xf32>
    %cst_69 = arith.constant 1.280000e+02 : f32
    %146 = vector.broadcast %cst_69 : f32 to vector<16x1xf32>
    %147 = arith.divf %145, %146 : vector<16x1xf32>
    %148 = vector.broadcast %140 : vector<16x1xf32> to vector<16x128xf32>
    %149 = arith.subf %132, %148 : vector<16x128xf32>
    %cst_70 = arith.constant 9.99999996E-13 : f32
    %150 = vector.broadcast %cst_70 : f32 to vector<16x1xf32>
    %151 = arith.addf %147, %150 : vector<16x1xf32>
    %152 = math.rsqrt %151 : vector<16x1xf32>
    %153 = vector.broadcast %152 : vector<16x1xf32> to vector<16x128xf32>
    %154 = arith.mulf %149, %153 : vector<16x128xf32>
    %155 = vector.broadcast %134 : vector<1x128xf32> to vector<16x128xf32>
    %156 = arith.mulf %154, %155 : vector<16x128xf32>
    %157 = vector.broadcast %136 : vector<1x128xf32> to vector<16x128xf32>
    %158 = arith.addf %156, %157 : vector<16x128xf32>
    %c0_71 = arith.constant 0 : index
    %c0_72 = arith.constant 0 : index
    %159 = vector.load %arg22[%c0_71, %c0_72] : memref<16x128xf32, #tpu.memory_space<vmem>>, vector<16x128xf32>
    tpu.vector_store %arg22[%c0_71, %c0_72], %158 {strides = array<i32>} : memref<16x128xf32, #tpu.memory_space<vmem>>, vector<16x128xf32>,
    %c1_i32 = arith.constant 1 : i32
    %160 = arith.cmpi eq, %arg0, %c1_i32 : i32
    %161 = arith.extui %160 : i1 to i32
    %c0_i32_73 = arith.constant 0 : i32
    %162 = arith.cmpi ne, %161, %c0_i32_73 : i32
    scf.if %162 {
      %163 = vector.shape_cast %158 : vector<16x128xf32> to vector<2x8x128xf32>
      %164 = vector.extract_strided_slice %163 {offsets = [0, 0, 0], sizes = [2, 1, 128], strides = [1, 1, 1]} : vector<2x8x128xf32> to vector<2x1x128xf32>
      %165 = vector.shape_cast %164 : vector<2x1x128xf32> to vector<2x128xf32>
      %166 = arith.truncf %165 : vector<2x128xf32> to vector<2x128xbf16>
      %c0_74 = arith.constant 0 : index
      %c0_75 = arith.constant 0 : index
      %167 = vector.load %arg17[%c0_74, %c0_75] : memref<128x128xbf16, #tpu.memory_space<vmem>>, vector<128x128xbf16>
      %cst_76 = arith.constant dense<0.000000e+00> : vector<2x128xf32>
      %168 = tpu.matmul %166, %167, %cst_76 {dimension_numbers = #tpu.dot_dimension_numbers<[1], [0], [0], [1], [0, 0, 1, 1], [], []>} : vector<2x128xbf16>, vector<128x128xbf16>, vector<2x128xf32> -> vector<2x128xf32>
      %c0_77 = arith.constant 0 : index
      %c0_78 = arith.constant 0 : index
      %169 = vector.load %arg18[%c0_77, %c0_78] : memref<1x128xf32, #tpu.memory_space<vmem>>, vector<1x128xf32>
      %170 = vector.broadcast %169 : vector<1x128xf32> to vector<2x128xf32>
      %171 = arith.addf %168, %170 : vector<2x128xf32>
      %172 = math.tanh %171 : vector<2x128xf32>
      %173 = arith.truncf %172 : vector<2x128xf32> to vector<2x128xbf16>
      %c0_79 = arith.constant 0 : index
      %c0_80 = arith.constant 0 : index
      %174 = vector.load %arg19[%c0_79, %c0_80] : memref<128x128xbf16, #tpu.memory_space<vmem>>, vector<128x128xbf16>
      %cst_81 = arith.constant dense<0.000000e+00> : vector<2x128xf32>
      %175 = tpu.matmul %173, %174, %cst_81 {dimension_numbers = #tpu.dot_dimension_numbers<[1], [0], [0], [1], [0, 0, 1, 1], [], []>} : vector<2x128xbf16>, vector<128x128xbf16>, vector<2x128xf32> -> vector<2x128xf32>
      %c0_82 = arith.constant 0 : index
      %c0_83 = arith.constant 0 : index
      %176 = vector.load %arg20[%c0_82, %c0_83] : memref<1x128xf32, #tpu.memory_space<vmem>>, vector<1x128xf32>
      %177 = vector.broadcast %176 : vector<1x128xf32> to vector<2x128xf32>
      %178 = arith.addf %175, %177 : vector<2x128xf32>
      %c0_84 = arith.constant 0 : index
      %c0_85 = arith.constant 0 : index
      %179 = vector.load %arg21[%c0_84, %c0_85] : memref<2x128xf32, #tpu.memory_space<vmem>>, vector<2x128xf32>
      tpu.vector_store %arg21[%c0_84, %c0_85], %178 {strides = array<i32>} : memref<2x128xf32, #tpu.memory_space<vmem>>, vector<2x128xf32>,
    } else {
    }
    return
  }
  func.func @transform_0(%arg0: i32) -> (i32, i32) {
    %c0_i32 = arith.constant 0 : i32
    %c0_i32_0 = arith.constant 0 : i32
    %c0_i32_1 = arith.constant 0 : i32
    return %c0_i32, %c0_i32_0 : i32, i32
  }
  func.func @transform_1(%arg0: i32) -> (i32, i32) {
    %c0_i32 = arith.constant 0 : i32
    %c0_i32_0 = arith.constant 0 : i32
    %c0_i32_1 = arith.constant 0 : i32
    return %c0_i32, %c0_i32_0 : i32, i32
  }
  func.func @transform_2(%arg0: i32) -> (i32, i32) {
    %c0_i32 = arith.constant 0 : i32
    %c0_i32_0 = arith.constant 0 : i32
    %c0_i32_1 = arith.constant 0 : i32
    return %c0_i32, %c0_i32_0 : i32, i32
  }
  func.func @transform_3(%arg0: i32) -> (i32, i32) {
    %c0_i32 = arith.constant 0 : i32
    %c0_i32_0 = arith.constant 0 : i32
    %c0_i32_1 = arith.constant 0 : i32
    return %c0_i32, %c0_i32_0 : i32, i32
  }
  func.func @transform_4(%arg0: i32) -> (i32, i32, i32) {
    %c0_i32 = arith.constant 0 : i32
    %c0_i32_0 = arith.constant 0 : i32
    %c0_i32_1 = arith.constant 0 : i32
    return %arg0, %c0_i32, %c0_i32_0 : i32, i32, i32
  }
  func.func @transform_5(%arg0: i32) -> (i32, i32, i32) {
    %c0_i32 = arith.constant 0 : i32
    %c0_i32_0 = arith.constant 0 : i32
    %c0_i32_1 = arith.constant 0 : i32
    return %arg0, %c0_i32, %c0_i32_0 : i32, i32, i32
  }
  func.func @transform_6(%arg0: i32) -> (i32, i32, i32) {
    %c0_i32 = arith.constant 0 : i32
    %c0_i32_0 = arith.constant 0 : i32
    %c0_i32_1 = arith.constant 0 : i32
    return %arg0, %c0_i32, %c0_i32_0 : i32, i32, i32
  }
  func.func @transform_7(%arg0: i32) -> (i32, i32, i32) {
    %c0_i32 = arith.constant 0 : i32
    %c0_i32_0 = arith.constant 0 : i32
    %c0_i32_1 = arith.constant 0 : i32
    return %arg0, %c0_i32, %c0_i32_0 : i32, i32, i32
  }
  func.func @transform_8(%arg0: i32) -> (i32, i32, i32) {
    %c0_i32 = arith.constant 0 : i32
    %c0_i32_0 = arith.constant 0 : i32
    %c0_i32_1 = arith.constant 0 : i32
    return %arg0, %c0_i32, %c0_i32_0 : i32, i32, i32
  }
  func.func @transform_9(%arg0: i32) -> (i32, i32, i32) {
    %c0_i32 = arith.constant 0 : i32
    %c0_i32_0 = arith.constant 0 : i32
    %c0_i32_1 = arith.constant 0 : i32
    return %arg0, %c0_i32, %c0_i32_0 : i32, i32, i32
  }
  func.func @transform_10(%arg0: i32) -> (i32, i32, i32) {
    %c0_i32 = arith.constant 0 : i32
    %c0_i32_0 = arith.constant 0 : i32
    %c0_i32_1 = arith.constant 0 : i32
    return %arg0, %c0_i32, %c0_i32_0 : i32, i32, i32
  }
  func.func @transform_11(%arg0: i32) -> (i32, i32, i32) {
    %c0_i32 = arith.constant 0 : i32
    %c0_i32_0 = arith.constant 0 : i32
    %c0_i32_1 = arith.constant 0 : i32
    return %arg0, %c0_i32, %c0_i32_0 : i32, i32, i32
  }
  func.func @transform_12(%arg0: i32) -> (i32, i32, i32) {
    %c0_i32 = arith.constant 0 : i32
    %c0_i32_0 = arith.constant 0 : i32
    %c0_i32_1 = arith.constant 0 : i32
    return %arg0, %c0_i32, %c0_i32_0 : i32, i32, i32
  }
  func.func @transform_13(%arg0: i32) -> (i32, i32, i32) {
    %c0_i32 = arith.constant 0 : i32
    %c0_i32_0 = arith.constant 0 : i32
    %c0_i32_1 = arith.constant 0 : i32
    return %arg0, %c0_i32, %c0_i32_0 : i32, i32, i32
  }
  func.func @transform_14(%arg0: i32) -> (i32, i32, i32) {
    %c0_i32 = arith.constant 0 : i32
    %c0_i32_0 = arith.constant 0 : i32
    %c0_i32_1 = arith.constant 0 : i32
    return %arg0, %c0_i32, %c0_i32_0 : i32, i32, i32
  }
  func.func @transform_15(%arg0: i32) -> (i32, i32, i32) {
    %c0_i32 = arith.constant 0 : i32
    %c0_i32_0 = arith.constant 0 : i32
    %c0_i32_1 = arith.constant 0 : i32
    return %arg0, %c0_i32, %c0_i32_0 : i32, i32, i32
  }
  func.func @transform_16(%arg0: i32) -> (i32, i32) {
    %c0_i32 = arith.constant 0 : i32
    %c0_i32_0 = arith.constant 0 : i32
    %c0_i32_1 = arith.constant 0 : i32
    return %c0_i32, %c0_i32_0 : i32, i32
  }
  func.func @transform_17(%arg0: i32) -> (i32, i32) {
    %c0_i32 = arith.constant 0 : i32
    %c0_i32_0 = arith.constant 0 : i32
    %c0_i32_1 = arith.constant 0 : i32
    return %c0_i32, %c0_i32_0 : i32, i32
  }
  func.func @transform_18(%arg0: i32) -> (i32, i32) {
    %c0_i32 = arith.constant 0 : i32
    %c0_i32_0 = arith.constant 0 : i32
    %c0_i32_1 = arith.constant 0 : i32
    return %c0_i32, %c0_i32_0 : i32, i32
  }
  func.func @transform_19(%arg0: i32) -> (i32, i32) {
    %c0_i32 = arith.constant 0 : i32
    %c0_i32_0 = arith.constant 0 : i32
    %c0_i32_1 = arith.constant 0 : i32
    return %c0_i32, %c0_i32_0 : i32, i32
  }
  func.func @transform_20(%arg0: i32) -> (i32, i32) {
    %c0_i32 = arith.constant 0 : i32
    %c0_i32_0 = arith.constant 0 : i32
    %c0_i32_1 = arith.constant 0 : i32
    return %c0_i32, %c0_i32_0 : i32, i32
  }
}

</mosaic_0001>

<bundles_post_ra>
// kernel: bert_class_forward.1
= control target key start
LH: loop header
LB: loop body
LE: loop exit
PB: predicated region body
PF: predicated region fallthrough
CT: control target
= control target key end

     0   :  { %s4265_s0 = inlined_call_operand.vmem [shape: f32[16,128], index: 0, kind: input, shape index: {}]   ;;  %s4266_s1 = inlined_call_operand.vmem [shape: f32[2,8], index: 1, kind: input, shape index: {}]   ;;  %s4267_s2 = inlined_call_operand.vmem [shape: f32[1,128], index: 2, kind: input, shape index: {}]   ;;  %s4268_s3 = inlined_call_operand.vmem [shape: f32[1,128], index: 3, kind: input, shape index: {}]   ;;  %s4269_s4 = inlined_call_operand.hbm [shape: bf16[2,128,384], index: 4, kind: input, shape index: {}]   ;;  %s4270_s5 = inlined_call_operand.vmem [shape: f32[2,1,384], index: 5, kind: input, shape index: {}]   ;;  %s4271_s6 = inlined_call_operand.vmem [shape: bf16[2,128,128], index: 6, kind: input, shape index: {}]   ;;  %s4272_s7 = inlined_call_operand.vmem [shape: f32[2,1,128], index: 7, kind: input, shape index: {}]   ;;  %s4273_s8 = inlined_call_operand.vmem [shape: f32[2,1,128], index: 8, kind: input, shape index: {}]   ;;  %s4274_s9 = inlined_call_operand.vmem [shape: f32[2,1,128], index: 9, kind: input, shape index: {}]   ;;  %s4275_s10 = inlined_call_operand.hbm [shape: bf16[2,128,512], index: 10, kind: input, shape index: {}]   ;;  %s4276_s11 = inlined_call_operand.vmem [shape: f32[2,1,512], index: 11, kind: input, shape index: {}]   ;;  %s4277_s12 = inlined_call_operand.hbm [shape: bf16[2,512,128], index: 12, kind: input, shape index: {}]   ;;  %s4278_s13 = inlined_call_operand.vmem [shape: f32[2,1,128], index: 13, kind: input, shape index: {}]   ;;  %s4279_s14 = inlined_call_operand.vmem [shape: f32[2,1,128], index: 14, kind: input, shape index: {}]   ;;  %s4280_s15 = inlined_call_operand.vmem [shape: f32[2,1,128], index: 15, kind: input, shape index: {}]   ;;  %s4281_s16 = inlined_call_operand.vmem [shape: bf16[128,128], index: 16, kind: input, shape index: {}]   ;;  %s4282_s17 = inlined_call_operand.vmem [shape: f32[1,128], index: 17, kind: input, shape index: {}]   ;;  %s4283_s18 = inlined_call_operand.vmem [shape: bf16[128,128], index: 18, kind: input, shape index: {}]   ;;  %s4284_s19 = inlined_call_operand.vmem [shape: f32[1,128], index: 19, kind: input, shape index: {}]   ;;  %s4285_s20 = inlined_call_operand.hbm [shape: f32[2,128], index: 20, kind: output, shape index: {}]  }
   0x1   :  { %4295 = sst [smem:[#allocation16_spill]] %s4265_s0 }
   0x2   :  { %4296 = sst [smem:[#allocation17_spill]] %s4266_s1 }
   0x3   :  { %4297 = sst [smem:[#allocation18_spill]] %s4267_s2 }
   0x4   :  { %4298 = sst [smem:[#allocation19_spill]] %s4268_s3 }
   0x5   :  { %4299 = sst [smem:[#allocation20_spill]] %s4269_s4 }
   0x6   :  { %4300 = sst [smem:[#allocation21_spill]] %s4270_s5 }
   0x7   :  { %4301 = sst [smem:[#allocation22_spill]] %s4271_s6 }
   0x8   :  { %4302 = sst [smem:[#allocation23_spill]] %s4275_s10 }
   0x9   :  { %4303 = sst [smem:[#allocation24_spill]] %s4277_s12 }
   0xa   :  { %4304 = sst [smem:[#allocation25_spill]] %s4278_s13 }
   0xb   :  { %4305 = sst [smem:[#allocation26_spill]] %s4279_s14 }
   0xc   :  { %4306 = sst [smem:[#allocation27_spill]] %s4280_s15 }
   0xd   :  { %4307 = sst [smem:[#allocation28_spill]] %s4281_s16 }
   0xe   :  { %4308 = sst [smem:[#allocation29_spill]] %s4282_s17 }
   0xf   :  { %4309 = sst [smem:[#allocation30_spill]] %s4283_s18 }
  0x10   :  { %4310 = sst [smem:[#allocation31_spill]] %s4284_s19 }
  0x11   :  { %4311 = sst [smem:[#allocation32_spill]] %s4285_s20 }
  0x12   :  { %25 = vsyncpa [#allocation4], 0 }
  0x13   :  { %27 = vsyncpa [#allocation4 + $0x1], 0 }
  0x14   :  { %28 = vsyncpa [#allocation7], 0 }
  0x15   :  { %30 = vsyncpa [#allocation7 + $0x1], 0 }
  0x16   :  { %31 = vsyncpa [#allocation5], 0  ;;  %s3687_s1 = smov 0   ;;  %s3689_s22 = smov 0  }
  0x17   :  { %s3691_s23 = smov 0   ;;  %s3693_s24 = smov 0  }
  0x18 LB: > { %4312 = sst [smem:[#allocation13_spill]] %s3566_s23  ;;  %s3706_s2 = sadd.s32 4294967295, %s3570_s24   ;;  %s3570_s24 = sphi %s3693_s24, %s4341_s24   ;;  %s3566_s23 = sphi %s3691_s23, %s4343_s23   ;;  %s3562_s22 = sphi %s3689_s22, %s4345_s22   ;;  %s3558_s1 = sphi %s3687_s1, %s4344_s1  }
  0x19   : > { %s3709_s25 = sadd.s32 1, %s3570_s24   ;;  %s128_s26 = sadd.s32 1, %s3566_s23 }
  0x1a   : > { %4313 = sst [smem:[#allocation14_spill]] %s3709_s25  ;;  %s125_s3 = ssub.s32 %s3570_s24, %s3709_s25 }
  0x1b   : > { %p126_p0 = scmp.eq.s32.totalorder %s125_s3, 0  ;;  %p135_p1 = scmp.ne.s32.totalorder %s3566_s23, %s3562_s22 }
  0x1c   : > { %p136_p2 = scmp.eq.s32.totalorder %s3570_s24, 0  ;;  %p141_p3 = scmp.ne.s32.totalorder %s3562_s22, %s3558_s1 }
  0x1d   : > { %s3719_s27 = scalar_select %p126_p0, %s3566_s23, %s128_s26  }
  0x1e   : > { %p137_p4 = por %p136_p2, %p135_p1  ;;  %p142_p5 = scmp.eq.s32.totalorder %s3706_s2, 0 }
  0x1f   : > { %4314 = sst [smem:[#allocation15_spill]] %s3719_s27  ;;  %p3305_p6 = scmp.lt.s32.totalorder %s3570_s24, 2 }
  0x20   : > { %p3723_p7 = por %p142_p5, %p141_p3  ;;  %s3728_s4 = sand.u32 1, %s3566_s23  }
  0x21   : > { %p3730_p8 = pnand %p3305_p6, %p137_p4  ;;  %s635_s30 = sand.u32 1, %s3570_s24  }
  0x22   : > { %s4291_s0 = sshll.u32 %s3728_s4, 8  ;;  %s3166_s21 = sshll.u32 %s3570_s24, 8 }
  0x23   : > { %s639_s1 = scalar_lea.vmem [#allocation6], %s4291_s0  ;;  %s4317_s10 = sld [smem:[#allocation23_spill]] }
  0x24   : > { %s647_s3 = sshll.u32 %s639_s1, 4  ;;  %s3742_s20 = scalar_lea.sflag [#allocation7], %s635_s30  ;;  %s648_s3 = int_to_ptr.vmem [resolvable:$true] %s647_s3 }
  0x25   : > { %p3414_p10 = pneg %p3730_p8 }
  0x29   : > { %s644_s25 = scalar_lea.hbm %s4317_s10, %s3166_s21  ;;  %s3417_s27 = scalar_lea.hbm %s4317_s10, 512 }
  0x2a   : > { %s645_s23 = sshll.u32 %s644_s25, 4  ;;  %s646_s23 = int_to_ptr.hbm [resolvable:$true] %s645_s23 }
  0x2b   : > { %s3410_s19 = sshra.s32 %s646_s23, 4  ;;  %s3411_s19 = int_to_ptr.hbm [resolvable:$true] %s3410_s19 }
  0x2c   : > { %s3412_s17 = scalar_lea.hbm %s3411_s19, 256  ;;  %p3418_p13 = scmp.lt.s32.totalorder %s3411_s19, %s4317_s10 }
  0x2d   : > { %p3413_p9 = scmp.ne.s32.totalorder %s3411_s19, %s3412_s17  ;;  %p3419_p0 = scmp.lt.s32.totalorder %s3417_s27, %s3412_s17 }
  0x2f   : > { %p3415_p11 = pnand %p3414_p10, %p3413_p9  ;;  %p3420_p1 = por %p3419_p0, %p3418_p13 }
  0x31   : > { %p3416_p12 = pneg %p3415_p11 }
  0x33   : > { %p3421_p2 = pnand %p3420_p1, %p3416_p12 }
  0x35   : > { %3424 = shalt.err (!%p3421_p2)
}
  0x36   : > { %s3572_s25 = smov 256   ;;  %s3573_s30 = smov 16  }
  0x37   : > { %3301 = dma.hbm_to_vmem [thread:$0]  (!%p3730_p8), %s646_s23, 4096, %s648_s3, %s3742_s20, %s3572_s25, %s3572_s25, %s3573_s30  }
  0x38   : > { %s4318_s12 = sld [smem:[#allocation24_spill]]  ;;  %s4319_s17 = sshll.u32 %s3728_s4, 8 }
  0x39   : > { %s668_s27 = scalar_lea.vmem [#allocation8], %s4319_s17  ;;  %p2696_p3 = scmp.ge.s32.totalorder %s3570_s24, 1 }
  0x3a   : > { %s676_s26 = sshll.u32 %s668_s27, 4  ;;  %p702_p4 = scmp.lt.s32.totalorder %s3570_s24, 3  ;;  %s3765_s26 = int_to_ptr.vmem [resolvable:$true] %s676_s26 }
  0x3b   : > { %s3281_s10 = smul.u32 192, %s3728_s4  ;;  %s4321_s25 = sld [smem:[#allocation20_spill]] }
  0x3c   : > { %p3770_p5 = pnand %p2696_p3, %p702_p4  ;;  %s3282_s23 = smul.u32 192, %s3570_s24 }
  0x3d   : > { %s584_s0 = scalar_lea.vmem [#allocation3], %s3281_s10  ;;  %s581_s17 = scalar_lea.sflag [#allocation4], %s3728_s4 }
  0x3e   : > { %s673_s18 = scalar_lea.hbm %s4318_s12, %s3166_s21  ;;  %s592_s1 = sshll.u32 %s584_s0, 4  ;;  %s593_s1 = int_to_ptr.vmem [resolvable:$true] %s592_s1 }
  0x3f   : > { %s674_s19 = sshll.u32 %s673_s18, 4  ;;  %s3763_s19 = int_to_ptr.hbm [resolvable:$true] %s674_s19 }
  0x41   : > { %s589_s30 = scalar_lea.hbm %s4321_s25, %s3282_s23  ;;  %s3447_s13 = scalar_lea.hbm %s4321_s25, 384 }
  0x42   : > { %s590_s18 = sshll.u32 %s589_s30, 4  ;;  %s591_s18 = int_to_ptr.hbm [resolvable:$true] %s590_s18 }
  0x43   : > { %s3440_s27 = sshra.s32 %s591_s18, 4  ;;  %s3441_s27 = int_to_ptr.hbm [resolvable:$true] %s3440_s27 }
  0x44   : > { %s3442_s15 = scalar_lea.hbm %s3441_s27, 192  ;;  %p3448_p12 = scmp.lt.s32.totalorder %s3441_s27, %s4321_s25 }
  0x45   : > { %p3443_p6 = scmp.ne.s32.totalorder %s3441_s27, %s3442_s15  ;;  %p3449_p13 = scmp.lt.s32.totalorder %s3447_s13, %s3442_s15 }
  0x47   : > { %p3445_p9 = pnand %p3443_p6, %p3414_p10  ;;  %p3450_p0 = por %p3449_p13, %p3448_p12 }
  0x49   : > { %p3446_p11 = pneg %p3445_p9 }
  0x4b   : > { %p3451_p1 = pnand %p3450_p0, %p3446_p11 }
  0x4d   : > { %3454 = shalt.err (!%p3451_p1)
}
  0x4e   : > { %s3574_s10 = smov 192   ;;  %s3575_s4 = smov 12  }
  0x4f   : > { %3298 = dma.hbm_to_vmem [thread:$0]  (!%p3730_p8), %s591_s18, 3072, %s593_s1, %s581_s17, %s3574_s10, %s3574_s10, %s3575_s4  }
  0x50   : > { %s3470_s21 = sshra.s32 %s3763_s19, 4  ;;  %s3477_s15 = scalar_lea.hbm %s4318_s12, 512  ;;  %s3471_s21 = int_to_ptr.hbm [resolvable:$true] %s3470_s21 }
  0x51   : > { %s3472_s30 = scalar_lea.hbm %s3471_s21, 256  ;;  %p3478_p6 = scmp.lt.s32.totalorder %s3471_s21, %s4318_s12 }
  0x52   : > { %p3473_p2 = scmp.ne.s32.totalorder %s3471_s21, %s3472_s30  ;;  %p3479_p9 = scmp.lt.s32.totalorder %s3477_s15, %s3472_s30 }
  0x54   : > { %p3475_p3 = pnand %p3473_p2, %p3414_p10  ;;  %p3480_p11 = por %p3479_p9, %p3478_p6 }
  0x56   : > { %p3476_p4 = pneg %p3475_p3 }
  0x58   : > { %p3481_p12 = pnand %p3480_p11, %p3476_p4 }
  0x5a   : > { %3484 = shalt.err (!%p3481_p12)
}
  0x5b   : > { %s3576_s1 = smov 64   ;;  %s3577_s18 = smov 4  }
  0x5c   : > { %3304 = dma.hbm_to_vmem [thread:$0]  (!%p3730_p8), %s3763_s19, 4096, %s3765_s26, %s3742_s20, %s3576_s1, %s3576_s1, %s3577_s18  }
  0x5d   : > { %706 = sbr.rel (%p3770_p5) target bundleno = 2525 (0x9dd), region = 100  ;;  %s708_s17 = sand.u32 (!%p3770_p5), 1, %s3562_s22  }
  0x5e   : > { %s3283_s24 = smul.u32 (!%p3770_p5), 192, %s708_s17  ;;  %s709_s3 = scalar_lea.sflag (!%p3770_p5), [#allocation4], %s708_s17 }
  0x60   : > { %s3808_s23 = scalar_lea.vmem (!%p3770_p5), [#allocation3], %s3283_s24 }
  0x62   : > { %3545 = dma.done.wait (%p3723_p7), %s709_s3, 3072  }
  0x63   : > { %3547 = vsyncadd (%p3723_p7), %s709_s3, 4294964224  ;;  %s718_s10 = sand.u32 1, %s3706_s2   ;;  %s2697_s29 = sshll.u32 %s708_s17, 8 }
  0x64   : > { %s719_s20 = scalar_lea.sflag [#allocation7], %s718_s10  ;;  %s3815_s19 = scalar_lea.vmem [#allocation6], %s2697_s29 }
  0x65   : > { %3549 = dma.done.wait (%p3723_p7), %s719_s20, 8192  }
  0x66   : > { %3551 = vsyncadd (%p3723_p7), %s719_s20, 4294959104  ;;  %p826_p8 = scmp.lt.s32.totalorder %s3706_s2, 1  ;;  %s4322_s6 = sld [smem:[#allocation22_spill]] }
  0x67   : > { %s4323_s5 = sld [smem:[#allocation21_spill]]  ;;  %s3867_s3 = scalar_lea.vmem [#allocation8], %s2697_s29 }
  0x68   : > { %s3823_s16 = scalar_select %p826_p8, %s3706_s2, 1 }
  0x69   : > { %s4324_s15 = sld [smem:[#allocation25_spill]]  ;;  %p2702_p7 = scmp.ne.s32.totalorder %s3706_s2, 0 }
  0x6a   : > { %s3284_s26 = smul.u32 3, %s3823_s16  ;;  %s3168_s4 = sshll.u32 %s3823_s16, 6 }
  0x6b   : > { %s843_s20 = scalar_lea.vmem %s4274_s9, %s3823_s16  ;;  %s2701_s21 = sshll.u32 %s3823_s16, 2 }
  0x6c   : > { %s3830_s28 = scalar_lea.vmem %s4322_s6, %s3168_s4  ;;  %s3853_s6 = scalar_lea.vmem %s4276_s11, %s2701_s21 }
  0x6d   : > { %s3839_s1 = scalar_lea.vmem %s4323_s5, %s3284_s26  ;;  %s4325_s5 = sld [smem:[#allocation26_spill]] }
  0x6e   : > { %s4326_s24 = sld [smem:[#allocation27_spill]] }
  0x6f   : > { %s850_s0 = scalar_lea.vmem %s4324_s15, %s3823_s16  ;;  %s4327_s4 = sld [smem:[#allocation16_spill]] (!%p2702_p7) }
  0x70   : > { %861 = sbr.rel (%p2702_p7) target bundleno = 393 (0x189), region = 116  ;;  %s4329_s26 = sld [smem:[#allocation19_spill]] (!%p2702_p7) }
  0x73   : > { %s853_s12 = scalar_lea.vmem %s4325_s5, %s3823_s16 }
  0x74   : > { %s856_s25 = scalar_lea.vmem %s4326_s24, %s3823_s16  ;;  %s4328_s24 = sld [smem:[#allocation18_spill]] (!%p2702_p7) }
  0x75   : > { %v862_v0 = vld [vmem:[%s4327_s4] sm:$0xff]  ;;  %v863_v1 = vld [vmem:[%s4327_s4 + $0x8] sm:$0xff]  ;;  %v3578_v2 = vmov 128.0  }
  0x76   : > { %866 = vadd.xlane.f32.xlu0 %v862_v0  ;;  %3352 = vrcp.f32 %v3578_v2  ;;  %v3351_v34 = vld [vmem:[%s4329_s26] ss:$0 sm:$0xff] }
  0x7a   : > { %v3350_v31 = vld [vmem:[%s4328_s24] ss:$0 sm:$0xff] }
  0x7c   : > { %v3353_v3 = vpop.eup %3352 }
  0x7d   : > { %v871_v4 = vmul.f32 128.0, %v3353_v3  ;;  %vm875_vm0 = vweird.f32 %v3353_v3 }
  0x7e   : > { %868 = vadd.xlane.f32.xlu0 %v863_v1 }
  0x7f   : > { %v872_v5 = vsub.f32 1.0, %v871_v4 }
  0x81   : > { %v873_v6 = vmul.f32 %v3353_v3, %v872_v5 }
  0x83   : > { %v874_v7 = vadd.f32 %v3353_v3, %v873_v6 }
  0x85   : > { %v876_v8 = vsel %vm875_vm0, %v3353_v3, %v874_v7 }
  0xe9   : > { %v867_v9 = vpop.xlane.xlu0 %866 }
  0xea   : > { %v877_v10 = vmul.f32 %v876_v8, %v867_v9 }
  0xec   : > { %v879_v11 = vsub.f32 %v862_v0, %v877_v10 }
  0xee   : > { %v881_v12 = vmul.f32 %v879_v11, %v879_v11 }
  0xf0   : > { %883 = vadd.xlane.f32.xlu1 %v881_v12 }
  0xf1   : > { %v869_v13 = vpop.xlane.xlu0 %868 }
  0xf2   : > { %v878_v14 = vmul.f32 %v876_v8, %v869_v13 }
  0xf4   : > { %v880_v15 = vsub.f32 %v863_v1, %v878_v14 }
  0xf6   : > { %v882_v16 = vmul.f32 %v880_v15, %v880_v15 }
  0xf8   : > { %885 = vadd.xlane.f32.xlu1 %v882_v16 }
 0x163   : > { %v884_v17 = vpop.xlane.xlu1 %883 }
 0x164   : > { %v887_v18 = vmul.f32 %v884_v17, %v876_v8 }
 0x166   : > { %v889_v19 = vadd.f32 1e-12, %v887_v18 }
 0x168   : > { %3354 = vrsqrt.f32 %v889_v19  ;;  %vm897_vm2 = vweird.f32 %v889_v19 }
 0x16b   : > { %v886_v20 = vpop.xlane.xlu1 %885 }
 0x16c   : > { %v888_v21 = vmul.f32 %v886_v20, %v876_v8 }
 0x16e   : > { %v3355_v22 = vpop.eup %3354  ;;  %v890_v23 = vadd.f32 1e-12, %v888_v21 }
 0x16f   : > { %v892_v24 = vmul.f32 %v3355_v22, %v889_v19  ;;  %vm898_vm1 = vweird.f32 %v3355_v22 }
 0x170   : > { %3356 = vrsqrt.f32 %v890_v23  ;;  %vm899_vm3 = vmor %vm897_vm2, %vm898_vm1  ;;  %vm907_vm5 = vweird.f32 %v890_v23 }
 0x171   : > { %v893_v25 = vmul.f32 %v3355_v22, %v892_v24 }
 0x173   : > { %v894_v26 = vmul.f32 0.5, %v893_v25 }
 0x175   : > { %v895_v27 = vsub.f32 1.5, %v894_v26 }
 0x176   : > { %v3357_v28 = vpop.eup %3356 }
 0x177   : > { %v896_v29 = vmul.f32 %v3355_v22, %v895_v27  ;;  %v902_v30 = vmul.f32 %v3357_v28, %v890_v23  ;;  %vm908_vm4 = vweird.f32 %v3357_v28 }
 0x178   : > { %vm909_vm6 = vmor %vm907_vm5, %vm908_vm4 }
 0x179   : > { %v900_v32 = vsel %vm899_vm3, %v3355_v22, %v896_v29  ;;  %v903_v33 = vmul.f32 %v3357_v28, %v902_v30 }
 0x17a   : > { %v911_v35 = vmul.f32 %v900_v32, %v879_v11 }
 0x17b   : > { %v904_v36 = vmul.f32 0.5, %v903_v33 }
 0x17c   : > { %v916_v37 = vmul.f32 %v3350_v31, %v911_v35 }
 0x17d   : > { %v905_v38 = vsub.f32 1.5, %v904_v36 }
 0x17e   : > { %v921_v39 = vadd.f32 %v3351_v34, %v916_v37 }
 0x17f   : > { %v906_v40 = vmul.f32 %v3357_v28, %v905_v38 }
 0x180   : > { %923 = vst [vmem:[#allocation2] sm:$0xff] %v921_v39 }
 0x181   : > { %v910_v41 = vsel %vm909_vm6, %v3357_v28, %v906_v40 }
 0x182   : > { %v912_v42 = vmul.f32 %v910_v41, %v880_v15 }
 0x184   : > { %v917_v43 = vmul.f32 %v3350_v31, %v912_v42 }
 0x186   : > { %v922_v44 = vadd.f32 %v3351_v34, %v917_v43 }
 0x188   : > { %924 = vst [vmem:[#allocation2 + $0x8] sm:$0xff] %v922_v44 }
 0x189 PF: > { %v2789_v45 = vld [vmem:[%s3808_s23 + $0xa8] sm:$0xf]  ;;  %v3191_v46 = vld [vmem:[%s3808_s23 + $0xb0] sm:$0xf0]  ;;  %v3190_v47 = vld [vmem:[%s3808_s23 + $0xac] sm:$0xf]  ;;  %s4331_s21 = scalar_lea.vmem %s4272_s7, %s3823_s16  ;;  %s4332_s30 = scalar_lea.vmem %s4273_s8, %s3823_s16 }
 0x18a   : > { %v2790_v48 = vor.u32 %v3191_v46, %v2789_v45  ;;  %v2791_v49 = vld [vmem:[%s3808_s23 + $0xb4] sm:$0xf0]  ;;  %v2777_v50 = vld [vmem:[%s3808_s23 + $0x90] sm:$0xf]  ;;  %v3188_v51 = vld [vmem:[%s3808_s23 + $0x98] sm:$0xf0] }
 0x18b   : > { %v2794_v52 = vor.u32 %v3190_v47, %v2791_v49  ;;  %v3187_v53 = vld [vmem:[%s3808_s23 + $0x94] sm:$0xf]  ;;  %v2779_v54 = vld [vmem:[%s3808_s23 + $0x9c] sm:$0xf0]  ;;  %v2778_v55 = vor.u32 %v3188_v51, %v2777_v50  ;;  %v2765_v57 = vld [vmem:[%s3808_s23 + $0x78] sm:$0xf] }
 0x18c   : > { %1096 = vmatpush.bf16.msra.mxu0 %v2790_v48  ;;  %v2782_v56 = vor.u32 %v3187_v53, %v2779_v54  ;;  %v3185_v58 = vld [vmem:[%s3808_s23 + $0x80] sm:$0xf0]  ;;  %v3184_v59 = vld [vmem:[%s3808_s23 + $0x7c] sm:$0xf]  ;;  %v2767_v60 = vld [vmem:[%s3808_s23 + $0x84] sm:$0xf0] }
 0x18d   : > { %1110 = vmatpush.bf16.msra.mxu1 %v2794_v52  ;;  %v2766_v61 = vor.u32 %v3185_v58, %v2765_v57  ;;  %v2770_v62 = vor.u32 %v3184_v59, %v2767_v60  ;;  %v2753_v63 = vld [vmem:[%s3808_s23 + $0x60] sm:$0xf]  ;;  %v3182_v0 = vld [vmem:[%s3808_s23 + $0x68] sm:$0xf0]  ;;  %v3181_v1 = vld [vmem:[%s3808_s23 + $0x64] sm:$0xf] }
 0x18e   : > { %v2755_v2 = vld [vmem:[%s3808_s23 + $0x6c] sm:$0xf0]  ;;  %v2741_v3 = vld [vmem:[%s3808_s23 + $0x48] sm:$0xf]  ;;  %v2754_v4 = vor.u32 %v3182_v0, %v2753_v63  ;;  %v3179_v5 = vld [vmem:[%s3808_s23 + $0x50] sm:$0xf0] }
 0x18f   : > { %v3178_v6 = vld [vmem:[%s3808_s23 + $0x4c] sm:$0xf]  ;;  %v2758_v7 = vor.u32 %v3181_v1, %v2755_v2  ;;  %v2743_v8 = vld [vmem:[%s3808_s23 + $0x54] sm:$0xf0]  ;;  %v2742_v9 = vor.u32 %v3179_v5, %v2741_v3  ;;  %v2729_v11 = vld [vmem:[%s3808_s23 + $0x30] sm:$0xf] }
 0x190   : > { %1097 = vmatpush.bf16.msra.mxu0 %v2778_v55  ;;  %v2746_v10 = vor.u32 %v3178_v6, %v2743_v8  ;;  %v3176_v12 = vld [vmem:[%s3808_s23 + $0x38] sm:$0xf0]  ;;  %v3175_v13 = vld [vmem:[%s3808_s23 + $0x34] sm:$0xf]  ;;  %v2731_v14 = vld [vmem:[%s3808_s23 + $0x3c] sm:$0xf0] }
 0x191   : > { %1111 = vmatpush.bf16.msra.mxu1 %v2782_v56  ;;  %v2730_v15 = vor.u32 %v3176_v12, %v2729_v11  ;;  %v2734_v16 = vor.u32 %v3175_v13, %v2731_v14  ;;  %v2717_v17 = vld [vmem:[%s3808_s23 + $0x18] sm:$0xf]  ;;  %v3173_v18 = vld [vmem:[%s3808_s23 + $0x20] sm:$0xf0]  ;;  %v3172_v19 = vld [vmem:[%s3808_s23 + $0x1c] sm:$0xf] }
 0x192   : > { %v2719_v20 = vld [vmem:[%s3808_s23 + $0x24] sm:$0xf0]  ;;  %v2718_v21 = vor.u32 %v3173_v18, %v2717_v17  ;;  %v2705_v23 = vld [vmem:[%s3808_s23] sm:$0xf]  ;;  %v3170_v24 = vld [vmem:[%s3808_s23 + $0x8] sm:$0xf0] }
 0x193   : > { %v2722_v22 = vor.u32 %v3172_v19, %v2719_v20  ;;  %v3169_v25 = vld [vmem:[%s3808_s23 + $0x4] sm:$0xf]  ;;  %v2707_v26 = vld [vmem:[%s3808_s23 + $0xc] sm:$0xf0]  ;;  %v2706_v27 = vor.u32 %v3170_v24, %v2705_v23  ;;  %v3916_v29 = vld [vmem:[#allocation2 + $0x8] sm:$0xff]  ;;  %vm1149_vm7 = vcmask 523264  }
 0x194   : > { %1098 = vmatpush.bf16.msra.mxu0 %v2766_v61  ;;  %v3914_v28 = vld [vmem:[#allocation2] sm:$0xff]  ;;  %v2710_v30 = vor.u32 %v3169_v25, %v2707_v26  ;;  %v3192_v37 = vld [vmem:[%s3808_s23 + $0xb8] sm:$0xf0]  ;;  %v2785_v38 = vld [vmem:[%s3808_s23 + $0x98] sm:$0xf]  ;;  %s4330_s18 = sld [smem:[#allocation17_spill]] }
 0x195   : > { %1112 = vmatpush.bf16.msra.mxu1 %v2770_v62  ;;  %v3920_v31 = vpack.c.bf16 %v3916_v29, %v3914_v28  ;;  %v3925_v32 = vld [vmem:[%s3839_s1] sm:$0x7]  ;;  %v3189_v42 = vld [vmem:[%s3808_s23 + $0xa0] sm:$0xf0]  ;;  %v2773_v46 = vld [vmem:[%s3808_s23 + $0x80] sm:$0xf] }
 0x196   : > { %v962_v33 = vperm.slane %v3925_v32, 0  ;;  %v963_v34 = vperm.slane %v3925_v32, 1  ;;  %v2797_v36 = vld [vmem:[%s3808_s23 + $0xb0] sm:$0xf]  ;;  %v2786_v44 = vor.u32 %v3189_v42, %v2785_v38  ;;  %v3186_v47 = vld [vmem:[%s3808_s23 + $0x88] sm:$0xf0] }
 0x197   : > { %v2798_v41 = vor.u32 %v3192_v37, %v2797_v36  ;;  %s3579_s1 = smov 64   ;;  %v2774_v50 = vor.u32 %v3186_v47, %v2773_v46  ;;  %v2761_v54 = vld [vmem:[%s3808_s23 + $0x68] sm:$0xf]  ;;  %v3183_v55 = vld [vmem:[%s3808_s23 + $0x70] sm:$0xf0]  ;;  %vm1196_vm8 = vcmask 64512  }
 0x198   : > { %1099 = vmatpush.bf16.msra.mxu0 %v2754_v4  ;;  %v2762_v59 = vor.u32 %v3183_v55, %v2761_v54  ;;  %v2749_v61 = vld [vmem:[%s3808_s23 + $0x50] sm:$0xf]  ;;  %v3180_v62 = vld [vmem:[%s3808_s23 + $0x58] sm:$0xf0]  ;;  %v2737_v4 = vld [vmem:[%s3808_s23 + $0x38] sm:$0xf] }
 0x199   : > { %1113 = vmatpush.bf16.msra.mxu1 %v2758_v7  ;;  %1124 = vmatpush.bf16.msra.mxu2 %v2798_v41  ;;  %v2750_v1 = vor.u32 %v3180_v62, %v2749_v61  ;;  %v3177_v5 = vld [vmem:[%s3808_s23 + $0x40] sm:$0xf0]  ;;  %v2725_v7 = vld [vmem:[%s3808_s23 + $0x20] sm:$0xf]  ;;  %v3174_v8 = vld [vmem:[%s3808_s23 + $0x28] sm:$0xf0] }
 0x19a   : > { %v2738_v6 = vor.u32 %v3177_v5, %v2737_v4  ;;  %v3171_v11 = vld [vmem:[%s3808_s23 + $0x10] sm:$0xf0]  ;;  %vm1250_vm9 = vcmask 1043456   ;;  %p3097_p10 = scmp.ne.s32.totalorder %s3706_s2, 1 }
 0x19b   : > { %s4336_s16 = sld [smem:[#allocation28_spill]] (!%p3097_p10) }
 0x19c   : > { %1100 = vmatpush.bf16.msra.mxu0 %v2742_v9  ;;  %v2726_v9 = vor.u32 %v3174_v8, %v2725_v7  ;;  %s4337_s17 = sld [smem:[#allocation30_spill]] (!%p3097_p10) }
 0x19d   : > { %1114 = vmatpush.bf16.msra.mxu1 %v2746_v10  ;;  %1125 = vmatpush.bf16.msra.mxu2 %v2786_v44  ;;  %v2713_v10 = vld [vmem:[%s3808_s23 + $0x8] sm:$0xf]  ;;  %s4338_s5 = sld [smem:[#allocation29_spill]] (!%p3097_p10) }
 0x19e   : > { %v2714_v12 = vor.u32 %v3171_v11, %v2713_v10 }
 0x1a0   : > { %1101 = vmatpush.bf16.msra.mxu0 %v2730_v15 }
 0x1a1   : > { %1115 = vmatpush.bf16.msra.mxu1 %v2734_v16  ;;  %1126 = vmatpush.bf16.msra.mxu2 %v2774_v50 }
 0x1a4   : > { %1102 = vmatpush.bf16.msra.mxu0 %v2718_v21  ;;  %v1142_v21 = vld [vmem:[%s4330_s18] sm:$0x3] }
 0x1a5   : > { %1116 = vmatpush.bf16.msra.mxu1 %v2722_v22  ;;  %1127 = vmatpush.bf16.msra.mxu2 %v2762_v59  ;;  %v1190_v22 = vperm.slane %v1142_v21, 0 }
 0x1a8   : > { %1103 = vmatpush.bf16.msra.mxu0 %v2706_v27 }
 0x1a9   : > { %1117 = vmatpush.bf16.msra.mxu1 %v2710_v30  ;;  %1128 = vmatpush.bf16.msra.mxu2 %v2750_v1  ;;  %v1144_v30 = vrot.slane %v1142_v21, 1 }
 0x1ab   : > { %1104 = vmatmul.bf16.vlgmr.msra.gmra.mxu0 %v3920_v31 }
 0x1ac   : > { %1118 = vmatmul.bf16.vlgmr.msra.gmra.mxu1 %v3920_v31 }
 0x1ad   : > { %1129 = vmatpush.bf16.msra.mxu2 %v2738_v6 }
 0x1b1   : > { %1130 = vmatpush.bf16.msra.mxu2 %v2726_v9 }
 0x1b5   : > { %1131 = vmatpush.bf16.msra.mxu2 %v2714_v12 }
 0x1b8   : > { %1132 = vmatmul.bf16.vlgmr.msra.gmra.mxu2 %v3920_v31  ;;  %v1191_v31 = vperm.slane %v1144_v30, 0 }
 0x228   : > { %v1105_v35 = vpop.f32.mrf.mxu0 }
 0x229   : > { %v1106_v39 = vadd.f32 %v1105_v35, %v962_v33  ;;  %v1119_v40 = vpop.f32.mrf.mxu1 }
 0x22a   : > { %v1120_v43 = vadd.f32 %v1119_v40, %v963_v34 }
 0x22c   : > { %v1138_v45 = vpack.c.bf16 %v1120_v43, %v1106_v39 }
 0x22e   : > { %1295 = vrot.lane.b32.xlu0 %v1138_v45, %s3579_s1  ;;  %v1147_v48 = vrot.slane %v1138_v45, 4  ;;  %v1301_v49 = vunpack.c.l.b16 %v1138_v45 }
 0x230   : > { %v1107_v51 = vpop.f32.mrf.mxu0  ;;  %v1154_v52 = vsel %vm1149_vm7, %v1147_v48, 0  ;;  %v1302_v53 = vpack.c.b16 %v1301_v49, %v1301_v49 }
 0x231   : > { %v1108_v56 = vadd.f32 %v1107_v51, %v962_v33  ;;  %v1121_v57 = vpop.f32.mrf.mxu1  ;;  %1163 = vmatpush.bf16.xpose.msra.mxu3 %v1154_v52  ;;  %v964_v33 = vperm.slane %v3925_v32, 2 }
 0x232   : > { %v1122_v58 = vadd.f32 %v1121_v57, %v963_v34  ;;  %1303 = vrot.lane.b32.xlu1 %v1302_v53, %s3579_s1 }
 0x234   : > { %v1140_v60 = vpack.c.bf16 %v1122_v58, %v1108_v56 }
 0x236   : > { %1297 = vrot.lane.b32.xlu0 %v1140_v60, %s3579_s1  ;;  %v1148_v63 = vrot.slane %v1140_v60, 4  ;;  %v1324_v0 = vunpack.c.l.b16 %v1140_v60 }
 0x238   : > { %2799 = vmatmul.msk.bf16.vlgmr.msra.gmra.mxu3 %vm1149_vm7, %v1138_v45  ;;  %v1173_v2 = vsel %vm1149_vm7, %v1148_v63, 0  ;;  %v1325_v3 = vpack.c.b16 %v1324_v0, %v1324_v0 }
 0x239   : > { %1182 = vmatpush.bf16.xpose.msrb.mxu3 %v1173_v2 }
 0x23a   : > { %1326 = vrot.lane.b32.xlu1 %v1325_v3, %s3579_s1 }
 0x23b   : > { %v1133_v36 = vpop.f32.mrf.mxu2 }
 0x23c   : > { %v1134_v38 = vadd.f32 %v1133_v36, %v964_v33 }
 0x23e   : > { %v3964_v40 = vpack.c.bf16 %v1134_v38, %v1134_v38 }
 0x240   : > { %v1252_v41 = vsel %vm1250_vm9, %v3964_v40, 0 }
 0x241   : > { %1261 = vmatpush.bf16.msra.mxu3 %v1252_v41 }
 0x243   : > { %v1135_v43 = vpop.f32.mrf.mxu2 }
 0x244   : > { %v1136_v44 = vadd.f32 %v1135_v43, %v964_v33 }
 0x246   : > { %v1141_v45 = vpack.c.bf16 %v1136_v44, %v1136_v44 }
 0x248   : > { %2800 = vmatmul.msk.bf16.vlgmr.msrb.gmra.mxu3 %vm1149_vm7, %v1140_v60  ;;  %v1271_v32 = vsel %vm1250_vm9, %v1141_v45, 0  ;;  %v1426_v58 = vunpack.c.l.b16 %v1141_v45 }
 0x249   : > { %1280 = vmatpush.bf16.msrb.mxu0 %v1271_v32 }
 0x24a   : > { %v1427_v61 = vpack.c.b16 %v1426_v58, %v1426_v58 }
 0x2a0   : > { %v1296_v13 = vpop.permute.xlu0 %1295 }
 0x2a1   : > { %v1299_v14 = vrot.slane %v1296_v13, 4 }
 0x2a3   : > { %v1309_v15 = vsel %vm1149_vm7, %v1299_v14, 0 }
 0x2a4   : > { %1318 = vmatpush.bf16.xpose.msrb.mxu1 %v1309_v15  ;;  %v1304_v16 = vpop.permute.xlu1 %1303 }
 0x2a8   : > { %v1298_v17 = vpop.permute.xlu0 %1297 }
 0x2a9   : > { %v1300_v18 = vrot.slane %v1298_v17, 4 }
 0x2ab   : > { %2803 = vmatmul.msk.bf16.vlgmr.msrb.gmra.mxu1 %vm1149_vm7, %v1304_v16  ;;  %v1332_v19 = vsel %vm1149_vm7, %v1300_v18, 0 }
 0x2ac   : > { %1341 = vmatpush.bf16.xpose.msrb.mxu2 %v1332_v19  ;;  %v1327_v20 = vpop.permute.xlu1 %1326 }
 0x2b3   : > { %2804 = vmatmul.msk.bf16.vlgmr.msrb.gmra.mxu2 %vm1149_vm7, %v1327_v20 }
 0x2bb   : > { %v1165_v23 = vpop.f32.mrf.mxu3 }
 0x2bc   : > { %v1188_v24 = vmul.f32 0.125, %v1165_v23 }
 0x2be   : > { %v1194_v25 = vadd.f32 %v1190_v22, %v1188_v24 }
 0x2c0   : > { %v1197_v26 = vsel %vm1196_vm8, %v1194_v25, -inf }
 0x2c1   : > { %1198 = vmax.xlane.f32.xlu2 %v1197_v26 }
 0x2c3   : > { %v1167_v27 = vpop.f32.mrf.mxu3 }
 0x2cb   : > { %v1184_v34 = vpop.f32.mrf.mxu3 }
 0x2cc   : > { %v1189_v35 = vmul.f32 0.125, %v1184_v34 }
 0x2ce   : > { %v1195_v37 = vadd.f32 %v1191_v31, %v1189_v35  ;;  %v1402_v35 = vunpack.c.l.b16 %v3964_v40 }
 0x2d0   : > { %v1200_v39 = vsel %vm1196_vm8, %v1195_v37, -inf  ;;  %v1403_v41 = vpack.c.b16 %v1402_v35, %v1402_v35 }
 0x2d1   : > { %1201 = vmax.xlane.f32.xlu2 %v1200_v39 }
 0x2d3   : > { %v1186_v42 = vpop.f32.mrf.mxu3 }
 0x328   : > { %v1320_v46 = vpop.f32.mrf.mxu1 }
 0x329   : > { %v1347_v47 = vmul.f32 0.125, %v1320_v46 }
 0x32b   : > { %v1349_v48 = vadd.f32 %v1347_v47, %v1190_v22  ;;  %v3196_v47 = vld [vmem:[%s3830_s28 + $0x18] sm:$0xff] }
 0x32c   : > { %1530 = vmatpush.bf16.msra.mxu2 %v3196_v47 }
 0x32d   : > { %v1351_v49 = vsel %vm1196_vm8, %v1349_v48, -inf }
 0x32e   : > { %1352 = vmax.xlane.f32.xlu0 %v1351_v49 }
 0x330   : > { %v1322_v50 = vpop.f32.mrf.mxu1 }
 0x334   : > { %v1199_v51 = vpop.xlane.xlu2 %1198 }
 0x335   : > { %v1203_v52 = vsub.f32 %v1194_v25, %v1199_v51 }
 0x336   : > { %v1343_v53 = vpop.f32.mrf.mxu2 }
 0x337   : > { %v1205_v54 = vmul.f32 1.442695, %v1203_v52  ;;  %v1348_v55 = vmul.f32 0.125, %v1343_v53  ;;  %v3195_v53 = vld [vmem:[%s3830_s28 + $0x10] sm:$0xff] }
 0x338   : > { %1531 = vmatpush.bf16.msra.mxu2 %v3195_v53 }
 0x339   : > { %3364 = vpow2.f32 %v1205_v54  ;;  %v1350_v56 = vadd.f32 %v1348_v55, %v1191_v31 }
 0x33b   : > { %v1354_v57 = vsel %vm1196_vm8, %v1350_v56, -inf }
 0x33c   : > { %1355 = vmax.xlane.f32.xlu1 %v1354_v57  ;;  %v3194_v57 = vld [vmem:[%s3830_s28 + $0x8] sm:$0xff] }
 0x33d   : > { %1532 = vmatpush.bf16.msra.mxu2 %v3194_v57 }
 0x33e   : > { %v1345_v59 = vpop.f32.mrf.mxu2 }
 0x33f   : > { %v3365_v60 = vpop.eup %3364 }
 0x340   : > { %v1209_v62 = vsel %vm1196_vm8, %v3365_v60, 0.0 }
 0x341   : > { %1210 = vadd.xlane.f32.xlu2 %v1209_v62 }
 0x342   : > { %1428 = vrot.lane.b32.xlu0 %v1427_v61, %s3579_s1 }
 0x344   : > { %v1202_v63 = vpop.xlane.xlu2 %1201 }
 0x345   : > { %v1204_v0 = vsub.f32 %v1195_v37, %v1202_v63  ;;  %v3193_v63 = vld [vmem:[%s3830_s28] sm:$0xff] }
 0x346   : > { %1533 = vmatpush.bf16.msra.mxu2 %v3193_v63  ;;  %v3230_v63 = vld [vmem:[%s3815_s19 + $0xec] sm:$0xf] }
 0x347   : > { %v1207_v1 = vmul.f32 1.442695, %v1204_v0 }
 0x349   : > { %3366 = vpow2.f32 %v1207_v1 }
 0x34f   : > { %v3367_v2 = vpop.eup %3366 }
 0x350   : > { %v1212_v3 = vsel %vm1196_vm8, %v3367_v2, 0.0 }
 0x351   : > { %1213 = vadd.xlane.f32.xlu2 %v1212_v3 }
 0x3a1   : > { %v1353_v4 = vpop.xlane.xlu0 %1352 }
 0x3a2   : > { %v1357_v5 = vsub.f32 %v1349_v48, %v1353_v4 }
 0x3a4   : > { %v1359_v6 = vmul.f32 1.442695, %v1357_v5 }
 0x3a6   : > { %3368 = vpow2.f32 %v1359_v6 }
 0x3ac   : > { %v3974_v7 = vpop.eup %3368 }
 0x3ad   : > { %v1363_v8 = vsel %vm1196_vm8, %v3974_v7, 0.0 }
 0x3ae   : > { %1364 = vadd.xlane.f32.xlu2 %v1363_v8 }
 0x3af   : > { %v1356_v9 = vpop.xlane.xlu1 %1355 }
 0x3b0   : > { %v1358_v10 = vsub.f32 %v1350_v56, %v1356_v9 }
 0x3b2   : > { %v1361_v11 = vmul.f32 1.442695, %v1358_v10 }
 0x3b4   : > { %3370 = vpow2.f32 %v1361_v11  ;;  %v1429_v12 = vpop.permute.xlu0 %1428  ;;  %v1211_v13 = vpop.xlane.xlu2 %1210  ;;  %v3200_v11 = vld [vmem:[%s3830_s28 + $0x38] sm:$0xff] }
 0x3b5   : > { %v1434_v14 = vsel %vm1250_vm9, %v1429_v12, 0  ;;  %3372 = vrcp.f32 %v1211_v13  ;;  %v1226_v20 = vand.u32 2147483648, %v1211_v13  ;;  %v1224_v22 = vand.u32 2147483647, %v1211_v13  ;;  %1489 = vmatpush.bf16.msra.mxu1 %v3200_v11  ;;  %v3226_v11 = vld [vmem:[%s3815_s19 + $0xcc] sm:$0xf] }
 0x3b6   : > { %1443 = vmatpush.bf16.msra.mxu0 %v1434_v14  ;;  %vm1220_vm11 = vweird.f32 %v1211_v13  ;;  %v3199_v14 = vld [vmem:[%s3830_s28 + $0x30] sm:$0xff] }
 0x3b7   : > { %v1227_v24 = vor.u32 1.1754944e-38, %v1226_v20  ;;  %vm1225_vm13 = vcmp.eq.f32.partialorder %v1224_v22, 8.507059e+37 }
 0x3b9   : > { %1490 = vmatpush.bf16.msra.mxu1 %v3199_v14  ;;  %v2923_v14 = vld [vmem:[%s3815_s19 + $0xa0] sm:$0xf] }
 0x3ba   : > { %v3979_v15 = vpop.eup %3370 }
 0x3bb   : > { %v3373_v16 = vpop.eup %3372  ;;  %v1366_v17 = vsel %vm1196_vm8, %v3979_v15, 0.0 }
 0x3bc   : > { %v1216_v18 = vmul.f32 %v3373_v16, %v1211_v13  ;;  %1367 = vadd.xlane.f32.xlu2 %v1366_v17  ;;  %vm1221_vm10 = vweird.f32 %v3373_v16  ;;  %v3198_v17 = vld [vmem:[%s3830_s28 + $0x28] sm:$0xff] }
 0x3bd   : > { %vm1222_vm12 = vmor %vm1220_vm11, %vm1221_vm10  ;;  %1491 = vmatpush.bf16.msra.mxu1 %v3198_v17  ;;  %v3221_v17 = vld [vmem:[%s3815_s19 + $0xa4] sm:$0xf] }
 0x3be   : > { %v1217_v19 = vsub.f32 1.0, %v1216_v18 }
 0x3c0   : > { %v1218_v21 = vmul.f32 %v3373_v16, %v1217_v19 }
 0x3c2   : > { %v1219_v23 = vadd.f32 %v3373_v16, %v1218_v21 }
 0x3c4   : > { %v1223_v25 = vsel %vm1222_vm12, %v3373_v16, %v1219_v23  ;;  %v1214_v26 = vpop.xlane.xlu2 %1213  ;;  %v3197_v23 = vld [vmem:[%s3830_s28 + $0x20] sm:$0xff] }
 0x3c5   : > { %v1228_v27 = vsel %vm1225_vm13, %v1227_v24, %v1223_v25  ;;  %3374 = vrcp.f32 %v1214_v26  ;;  %v1241_v37 = vand.u32 2147483648, %v1214_v26  ;;  %v1239_v39 = vand.u32 2147483647, %v1214_v26  ;;  %1492 = vmatpush.bf16.msra.mxu1 %v3197_v23 }
 0x3c6   : > { %v1229_v30 = vmul.f32 %v3365_v60, %v1228_v27  ;;  %vm1235_vm15 = vweird.f32 %v1214_v26 }
 0x3c7   : > { %v1242_v43 = vor.u32 1.1754944e-38, %v1241_v37  ;;  %vm1240_vm1 = vcmp.eq.f32.partialorder %v1239_v39, 8.507059e+37 }
 0x3c8   : > { %v1245_v31 = vpack.c.bf16 %v1229_v30, %v1229_v30 }
 0x3ca   : > { %2801 = vmatmul.msk.bf16.vlgmr.msra.gmra.mxu3 %vm1196_vm8, %v1245_v31  ;;  %v3358_v31 = vld [vmem:[%s4331_s21] ss:$0 sm:$0xff] }
 0x3cb   : > { %v3375_v33 = vpop.eup %3374 }
 0x3cc   : > { %v1231_v34 = vmul.f32 %v3375_v33, %v1214_v26  ;;  %vm1236_vm14 = vweird.f32 %v3375_v33 }
 0x3cd   : > { %vm1237_vm0 = vmor %vm1235_vm15, %vm1236_vm14 }
 0x3ce   : > { %v1232_v36 = vsub.f32 1.0, %v1231_v34 }
 0x3d0   : > { %v1233_v38 = vmul.f32 %v3375_v33, %v1232_v36 }
 0x3d2   : > { %v1234_v42 = vadd.f32 %v3375_v33, %v1233_v38 }
 0x3d4   : > { %1404 = vrot.lane.b32.xlu2 %v1403_v41, %s3579_s1  ;;  %v1238_v44 = vsel %vm1237_vm0, %v3375_v33, %v1234_v42 }
 0x3d5   : > { %v1243_v45 = vsel %vm1240_vm1, %v1242_v43, %v1238_v44  ;;  %v3580_v43 = vmov 128.0  }
 0x3d6   : > { %v1244_v32 = vmul.f32 %v3367_v2, %v1243_v45 }
 0x3d8   : > { %v1246_v46 = vpack.c.bf16 %v1244_v32, %v1244_v32 }
 0x3da   : > { %2802 = vmatmul.msk.bf16.vlgmr.msrb.gmra.mxu0 %vm1196_vm8, %v1246_v46 }
 0x421   : > { %v1365_v40 = vpop.xlane.xlu2 %1364 }
 0x422   : > { %3376 = vrcp.f32 %v1365_v40  ;;  %v1380_v52 = vand.u32 2147483648, %v1365_v40  ;;  %v1378_v54 = vand.u32 2147483647, %v1365_v40  ;;  %vm1374_vm3 = vweird.f32 %v1365_v40 }
 0x424   : > { %v1381_v59 = vor.u32 1.1754944e-38, %v1380_v52  ;;  %vm1379_vm5 = vcmp.eq.f32.partialorder %v1378_v54, 8.507059e+37  ;;  %v2955_v54 = vld [vmem:[%s3815_s19 + $0xe0] sm:$0xf] }
 0x428   : > { %v3377_v48 = vpop.eup %3376 }
 0x429   : > { %v1370_v49 = vmul.f32 %v3377_v48, %v1365_v40  ;;  %vm1375_vm2 = vweird.f32 %v3377_v48 }
 0x42a   : > { %vm1376_vm4 = vmor %vm1374_vm3, %vm1375_vm2 }
 0x42b   : > { %v1371_v50 = vsub.f32 1.0, %v1370_v49 }
 0x42d   : > { %v1372_v51 = vmul.f32 %v3377_v48, %v1371_v50 }
 0x42f   : > { %v1373_v55 = vadd.f32 %v3377_v48, %v1372_v51  ;;  %v1368_v56 = vpop.xlane.xlu2 %1367 }
 0x430   : > { %3378 = vrcp.f32 %v1368_v56  ;;  %v1395_v4 = vand.u32 2147483648, %v1368_v56  ;;  %v1393_v8 = vand.u32 2147483647, %v1368_v56  ;;  %vm1389_vm10 = vweird.f32 %v1368_v56 }
 0x431   : > { %v1377_v58 = vsel %vm1376_vm4, %v3377_v48, %v1373_v55  ;;  %3380 = vrcp.f32 %v3580_v43  ;;  %v3231_v55 = vld [vmem:[%s3815_s19 + $0xec] sm:$0xf0] }
 0x432   : > { %v1382_v60 = vsel %vm1379_vm5, %v1381_v59, %v1377_v58  ;;  %vm1394_vm12 = vcmp.eq.f32.partialorder %v1393_v8, 8.507059e+37  ;;  %v2956_v57 = vor.u32 %v3231_v55, %v2955_v54  ;;  %v2957_v58 = vld [vmem:[%s3815_s19 + $0xf0] sm:$0xf0]  ;;  %v2963_v59 = vld [vmem:[%s3815_s19 + $0xe8] sm:$0xf] }
 0x433   : > { %v1383_v62 = vmul.f32 %v3974_v7, %v1382_v60  ;;  %v1396_v7 = vor.u32 1.1754944e-38, %v1395_v4  ;;  %v3232_v60 = vld [vmem:[%s3815_s19 + $0xf4] sm:$0xf0]  ;;  %v3225_v4 = vld [vmem:[%s3815_s19 + $0xc4] sm:$0xf] }
 0x434   : > { %v2947_v8 = vld [vmem:[%s3815_s19 + $0xc8] sm:$0xf]  ;;  %v3215_v43 = vld [vmem:[%s3815_s19 + $0x6c] sm:$0xf0]  ;;  %v3209_v55 = vld [vmem:[%s3815_s19 + $0x44] sm:$0xf] }
 0x435   : > { %v1399_v5 = vpack.c.bf16 %v1383_v62, %v1383_v62  ;;  %v2964_v62 = vor.u32 %v3232_v60, %v2963_v59  ;;  %v3211_v54 = vld [vmem:[%s3815_s19 + $0x4c] sm:$0xf0]  ;;  %v3212_v59 = vld [vmem:[%s3815_s19 + $0x54] sm:$0xf0] }
 0x436   : > { %v3379_v61 = vpop.eup %3378 }
 0x437   : > { %v1385_v0 = vmul.f32 %v3379_v61, %v1368_v56  ;;  %v1405_v1 = vpop.permute.xlu2 %1404  ;;  %vm1390_vm6 = vweird.f32 %v3379_v61  ;;  %v3381_v44 = vpop.eup %3380  ;;  %v3229_v56 = vld [vmem:[%s3815_s19 + $0xe4] sm:$0xf]  ;;  %1838 = vmatpush.bf16.msrb.mxu1 %v2964_v62  ;;  %v3210_v62 = vld [vmem:[%s3815_s19 + $0x4c] sm:$0xf] }
 0x438   : > { %v1410_v2 = vsel %vm1250_vm9, %v1405_v1, 0  ;;  %vm1391_vm11 = vmor %vm1389_vm10, %vm1390_vm6  ;;  %v1555_v45 = vmul.f32 128.0, %v3381_v44 }
 0x439   : > { %v1386_v3 = vsub.f32 1.0, %v1385_v0  ;;  %1419 = vmatpush.bf16.msrb.mxu3 %v1410_v2  ;;  %v2965_v0 = vld [vmem:[%s3815_s19 + $0xf8] sm:$0xf0]  ;;  %v2939_v2 = vld [vmem:[%s3815_s19 + $0xc0] sm:$0xf] }
 0x43a   : > { %v1556_v32 = vsub.f32 1.0, %v1555_v45  ;;  %v2968_v1 = vor.u32 %v3230_v63, %v2965_v0  ;;  %v2885_v63 = vld [vmem:[%s3815_s19 + $0x58] sm:$0xf0] }
 0x43b   : > { %v1387_v6 = vmul.f32 %v3379_v61, %v1386_v3  ;;  %v3227_v3 = vld [vmem:[%s3815_s19 + $0xcc] sm:$0xf0]  ;;  %v2888_v0 = vor.u32 %v3210_v62, %v2885_v63  ;;  %v3254_v62 = vld [vmem:[%s3867_s3 + $0xa8] sm:$0xff] }
 0x43c   : > { %2805 = vmatmul.msk.bf16.vlgmr.msrb.gmra.mxu3 %vm1196_vm8, %v1399_v5  ;;  %v1557_v46 = vmul.f32 %v3381_v44, %v1556_v32  ;;  %1852 = vmatpush.bf16.msrb.mxu2 %v2968_v1  ;;  %v2940_v5 = vor.u32 %v3227_v3, %v2939_v2  ;;  %v2893_v32 = vld [vmem:[%s3815_s19 + $0x70] sm:$0xf0]  ;;  %v2859_v1 = vld [vmem:[%s3815_s19 + $0x20] sm:$0xf]  ;;  %v3207_v2 = vld [vmem:[%s3815_s19 + $0x2c] sm:$0xf0] }
 0x43d   : > { %v1388_v9 = vadd.f32 %v3379_v61, %v1387_v6  ;;  %1810 = vmatpush.bf16.msra.mxu3 %v2956_v57  ;;  %v2941_v6 = vld [vmem:[%s3815_s19 + $0xd0] sm:$0xf0]  ;;  %v3205_v3 = vld [vmem:[%s3815_s19 + $0x24] sm:$0xf] }
 0x43e   : > { %v1558_v40 = vadd.f32 %v3381_v44, %v1557_v46  ;;  %v2899_v46 = vld [vmem:[%s3815_s19 + $0x68] sm:$0xf]  ;;  %v2877_v57 = vld [vmem:[%s3815_s19 + $0x50] sm:$0xf0] }
 0x43f   : > { %v1392_v10 = vsel %vm1391_vm11, %v3379_v61, %v1388_v9  ;;  %v2960_v61 = vor.u32 %v3229_v56, %v2957_v58  ;;  %v3228_v9 = vld [vmem:[%s3815_s19 + $0xd4] sm:$0xf0]  ;;  %v2883_v58 = vld [vmem:[%s3815_s19 + $0x48] sm:$0xf]  ;;  %v2880_v60 = vor.u32 %v3209_v55, %v2877_v57  ;;  %v3247_v57 = vld [vmem:[%s3867_s3 + $0x70] sm:$0xff] }
 0x440   : > { %v1397_v12 = vsel %vm1394_vm12, %v1396_v7, %v1392_v10  ;;  %v2944_v7 = vor.u32 %v3225_v4, %v2941_v6  ;;  %v2948_v10 = vor.u32 %v3228_v9, %v2947_v8  ;;  %v2860_v4 = vor.u32 %v3207_v2, %v2859_v1  ;;  %v2867_v6 = vld [vmem:[%s3815_s19 + $0x28] sm:$0xf]  ;;  %v3208_v8 = vld [vmem:[%s3815_s19 + $0x34] sm:$0xf0]  ;;  %v3239_v63 = vld [vmem:[%s3867_s3 + $0x30] sm:$0xff] }
 0x441   : > { %v1398_v13 = vmul.f32 %v3979_v15, %v1397_v12  ;;  %1824 = vmatpush.bf16.msrb.mxu0 %v2960_v61  ;;  %v2949_v12 = vld [vmem:[%s3815_s19 + $0xd8] sm:$0xf0]  ;;  %1811 = vmatpush.bf16.msra.mxu3 %v2940_v5  ;;  %v2884_v61 = vor.u32 %v3212_v59, %v2883_v58  ;;  %v2861_v5 = vld [vmem:[%s3815_s19 + $0x30] sm:$0xf0]  ;;  %v3245_v1 = vld [vmem:[%s3867_s3 + $0x60] sm:$0xff] }
 0x442   : > { %1839 = vmatpush.bf16.msrb.mxu1 %v2948_v10  ;;  %v2868_v10 = vor.u32 %v3208_v8, %v2867_v6  ;;  %v3255_v58 = vld [vmem:[%s3867_s3 + $0xb0] sm:$0xff]  ;;  %v3240_v59 = vld [vmem:[%s3867_s3 + $0x38] sm:$0xff]  ;;  %v3253_v2 = vld [vmem:[%s3867_s3 + $0xa0] sm:$0xff] }
 0x443   : > { %v1400_v16 = vpack.c.bf16 %v1398_v13, %v1398_v13  ;;  %v2952_v13 = vor.u32 %v3226_v11, %v2949_v12  ;;  %v3206_v11 = vld [vmem:[%s3815_s19 + $0x2c] sm:$0xf]  ;;  %v2869_v12 = vld [vmem:[%s3815_s19 + $0x38] sm:$0xf0]  ;;  %v3237_v8 = vld [vmem:[%s3867_s3 + $0x20] sm:$0xff] }
 0x444   : > { %v3252_v6 = vld [vmem:[%s3867_s3 + $0x98] sm:$0xff] }
 0x445   : > { %2806 = vmatmul.msk.bf16.vlgmr.msra.gmra.mxu0 %vm1196_vm8, %v1400_v16  ;;  %v3223_v16 = vld [vmem:[%s3815_s19 + $0xac] sm:$0xf0]  ;;  %1853 = vmatpush.bf16.msrb.mxu2 %v2952_v13  ;;  %v2843_v13 = vld [vmem:[%s3815_s19] sm:$0xf] }
 0x446   : > { %1825 = vmatpush.bf16.msrb.mxu0 %v2944_v7  ;;  %v2864_v7 = vor.u32 %v3205_v3, %v2861_v5  ;;  %v3238_v3 = vld [vmem:[%s3867_s3 + $0x28] sm:$0xff]  ;;  %v3244_v5 = vld [vmem:[%s3867_s3 + $0x58] sm:$0xff] }
 0x44d   : > { %v1263_v18 = vpop.f32.mrf.mxu3 }
 0x455   : > { %v1265_v19 = vpop.f32.mrf.mxu3 }
 0x456   : > { %v2925_v19 = vld [vmem:[%s3815_s19 + $0xb0] sm:$0xf0] }
 0x457   : > { %v1282_v20 = vpop.f32.mrf.mxu0 }
 0x458   : > { %v1286_v21 = vpack.c.bf16 %v1282_v20, %v1263_v18  ;;  %v2924_v18 = vor.u32 %v3223_v16, %v2923_v14  ;;  %v2931_v20 = vld [vmem:[%s3815_s19 + $0xa8] sm:$0xf]  ;;  %v2872_v16 = vor.u32 %v3206_v11, %v2869_v12  ;;  %v3236_v11 = vld [vmem:[%s3867_s3 + $0x18] sm:$0xff] }
 0x459   : > { %v3260_v12 = vld [vmem:[%s3867_s3 + $0xd8] sm:$0xff] }
 0x45a   : > { %2840 = vmatmul.msk.bf16.vlgmr.msra.gmra.mxu2 %vm1149_vm7, %v1286_v21  ;;  %v3224_v21 = vld [vmem:[%s3815_s19 + $0xb4] sm:$0xf0]  ;;  %1812 = vmatpush.bf16.msra.mxu3 %v2924_v18  ;;  %v3201_v18 = vld [vmem:[%s3815_s19 + $0x4] sm:$0xf] }
 0x45b   : > { %v2932_v23 = vor.u32 %v3224_v21, %v2931_v20 }
 0x45d   : > { %1840 = vmatpush.bf16.msrb.mxu1 %v2932_v23  ;;  %v3204_v23 = vld [vmem:[%s3815_s19 + $0x14] sm:$0xf0] }
 0x45f   : > { %v1284_v22 = vpop.f32.mrf.mxu0 }
 0x460   : > { %v2928_v22 = vor.u32 %v3221_v17, %v2925_v19  ;;  %v3203_v17 = vld [vmem:[%s3815_s19 + $0xc] sm:$0xf0]  ;;  %v2845_v19 = vld [vmem:[%s3815_s19 + $0x10] sm:$0xf0] }
 0x461   : > { %v2844_v20 = vor.u32 %v3203_v17, %v2843_v13  ;;  %v2848_v21 = vor.u32 %v3201_v18, %v2845_v19  ;;  %v4128_v13 = vld [vmem:[%s3853_s6] sm:$0xf]  ;;  %v3241_v19 = vld [vmem:[%s3867_s3 + $0x40] sm:$0xff] }
 0x462   : > { %1826 = vmatpush.bf16.msrb.mxu0 %v2928_v22  ;;  %v2851_v22 = vld [vmem:[%s3815_s19 + $0x8] sm:$0xf]  ;;  %v3235_v17 = vld [vmem:[%s3867_s3 + $0x10] sm:$0xff] }
 0x463   : > { %v3259_v18 = vld [vmem:[%s3867_s3 + $0xd0] sm:$0xff] }
 0x4bf   : > { %v1421_v24 = vpop.f32.mrf.mxu3 }
 0x4c2   : > { %v1445_v15 = vpop.f32.mrf.mxu0 }
 0x4c3   : > { %v1449_v25 = vpack.c.bf16 %v1445_v15, %v1421_v24  ;;  %v3222_v24 = vld [vmem:[%s3815_s19 + $0xac] sm:$0xf]  ;;  %v2933_v15 = vld [vmem:[%s3815_s19 + $0xb8] sm:$0xf0] }
 0x4c5   : > { %2823 = vmatmul.msk.bf16.vlgmr.msra.gmra.mxu1 %vm1149_vm7, %v1449_v25  ;;  %vm1559_vm7 = vweird.f32 %v3381_v44  ;;  %v2936_v25 = vor.u32 %v3222_v24, %v2933_v15  ;;  %v3202_v24 = vld [vmem:[%s3815_s19 + $0xc] sm:$0xf] }
 0x4c7   : > { %v1423_v26 = vpop.f32.mrf.mxu3  ;;  %1854 = vmatpush.bf16.msrb.mxu2 %v2936_v25  ;;  %v2852_v25 = vor.u32 %v3204_v23, %v2851_v22  ;;  %v1644_v22 = vperm.slane %v4128_v13, 2  ;;  %v3234_v23 = vld [vmem:[%s3867_s3 + $0x8] sm:$0xff] }
 0x4c8   : > { %v2907_v26 = vld [vmem:[%s3815_s19 + $0x80] sm:$0xf] }
 0x4ca   : > { %v1447_v27 = vpop.f32.mrf.mxu0 }
 0x4cb   : > { %v3219_v27 = vld [vmem:[%s3815_s19 + $0x8c] sm:$0xf0] }
 0x4dd   : > { %v1535_v30 = vpop.f32.mrf.mxu2 }
 0x4e5   : > { %v1537_v37 = vpop.f32.mrf.mxu2 }
 0x542   : > { %v1494_v33 = vpop.f32.mrf.mxu1 }
 0x543   : > { %v1536_v34 = vadd.f32 %v1535_v30, %v1494_v33  ;;  %v3217_v30 = vld [vmem:[%s3815_s19 + $0x84] sm:$0xf]  ;;  %v2909_v33 = vld [vmem:[%s3815_s19 + $0x90] sm:$0xf0] }
 0x545   : > { %v1544_v35 = vadd.f32 %v3358_v31, %v1536_v34  ;;  %v2915_v34 = vld [vmem:[%s3815_s19 + $0x88] sm:$0xf] }
 0x547   : > { %v1546_v36 = vadd.f32 %v1544_v35, %v3914_v28  ;;  %v4009_v28 = vsel %vm1559_vm7, %v3381_v44, %v1558_v40  ;;  %v3220_v35 = vld [vmem:[%s3815_s19 + $0x94] sm:$0xf0]  ;;  %v3213_v44 = vld [vmem:[%s3815_s19 + $0x64] sm:$0xf] }
 0x548   : > { %v3216_v40 = vld [vmem:[%s3815_s19 + $0x74] sm:$0xf0] }
 0x549   : > { %1550 = vadd.xlane.f32.xlu1 %v1546_v36 }
 0x54a   : > { %v1496_v38 = vpop.f32.mrf.mxu1 }
 0x54b   : > { %v1538_v39 = vadd.f32 %v1537_v37, %v1496_v38  ;;  %v2916_v37 = vor.u32 %v3220_v35, %v2915_v34  ;;  %v3218_v38 = vld [vmem:[%s3815_s19 + $0x8c] sm:$0xf] }
 0x54d   : > { %v1545_v41 = vadd.f32 %v3358_v31, %v1538_v39  ;;  %v2908_v31 = vor.u32 %v3219_v27, %v2907_v26  ;;  %v2917_v39 = vld [vmem:[%s3815_s19 + $0x98] sm:$0xf0]  ;;  %1841 = vmatpush.bf16.msrb.mxu1 %v2916_v37 }
 0x54e   : > { %v2853_v26 = vld [vmem:[%s3815_s19 + $0x18] sm:$0xf0] }
 0x54f   : > { %v1547_v42 = vadd.f32 %v1545_v41, %v3916_v29  ;;  %1813 = vmatpush.bf16.msra.mxu3 %v2908_v31  ;;  %v2920_v41 = vor.u32 %v3218_v38, %v2917_v39  ;;  %v2856_v27 = vor.u32 %v3202_v24, %v2853_v26  ;;  %v3258_v24 = vld [vmem:[%s3867_s3 + $0xc8] sm:$0xff] }
 0x551   : > { %1552 = vadd.xlane.f32.xlu1 %v1547_v42  ;;  %1855 = vmatpush.bf16.msrb.mxu2 %v2920_v41 }
 0x5bc   : > { %v1551_v47 = vpop.xlane.xlu1 %1550 }
 0x5bd   : > { %v1561_v29 = vmul.f32 %v4009_v28, %v1551_v47  ;;  %v2896_v47 = vor.u32 %v3213_v44, %v2893_v32 }
 0x5bf   : > { %v4012_v48 = vsub.f32 %v1546_v36, %v1561_v29  ;;  %v2912_v36 = vor.u32 %v3217_v30, %v2909_v33  ;;  %v2900_v29 = vor.u32 %v3216_v40, %v2899_v46  ;;  %v3359_v40 = vld [vmem:[%s4332_s30] ss:$0 sm:$0xff] }
 0x5c1   : > { %v1565_v49 = vmul.f32 %v4012_v48, %v4012_v48  ;;  %1827 = vmatpush.bf16.msrb.mxu0 %v2912_v36  ;;  %1842 = vmatpush.bf16.msrb.mxu1 %v2900_v29 }
 0x5c3   : > { %1567 = vadd.xlane.f32.xlu2 %v1565_v49  ;;  %v3214_v49 = vld [vmem:[%s3815_s19 + $0x6c] sm:$0xf] }
 0x5c4   : > { %v1553_v50 = vpop.xlane.xlu1 %1552 }
 0x5c5   : > { %v1562_v51 = vmul.f32 %v4009_v28, %v1553_v50  ;;  %v2901_v50 = vld [vmem:[%s3815_s19 + $0x78] sm:$0xf0]  ;;  %1828 = vmatpush.bf16.msrb.mxu0 %v2896_v47  ;;  %1843 = vmatpush.bf16.msrb.mxu1 %v2884_v61  ;;  %v3246_v61 = vld [vmem:[%s3867_s3 + $0x68] sm:$0xff] }
 0x5c7   : > { %v4017_v52 = vsub.f32 %v1547_v42, %v1562_v51  ;;  %v2891_v42 = vld [vmem:[%s3815_s19 + $0x60] sm:$0xf]  ;;  %v2904_v51 = vor.u32 %v3214_v49, %v2901_v50 }
 0x5c8   : > { %v2892_v45 = vor.u32 %v3215_v43, %v2891_v42 }
 0x5c9   : > { %v1566_v53 = vmul.f32 %v4017_v52, %v4017_v52  ;;  %1856 = vmatpush.bf16.msrb.mxu2 %v2904_v51  ;;  %1829 = vmatpush.bf16.msrb.mxu0 %v2880_v60  ;;  %v3264_v60 = vld [vmem:[%s3867_s3 + $0xf8] sm:$0xff] }
 0x5ca   : > { %1814 = vmatpush.bf16.msra.mxu3 %v2892_v45  ;;  %1844 = vmatpush.bf16.msrb.mxu1 %v2868_v10  ;;  %v3251_v10 = vld [vmem:[%s3867_s3 + $0x90] sm:$0xff] }
 0x5cb   : > { %1569 = vadd.xlane.f32.xlu1 %v1566_v53  ;;  %v2875_v53 = vld [vmem:[%s3815_s19 + $0x40] sm:$0xf] }
 0x5cc   : > { %v2876_v56 = vor.u32 %v3211_v54, %v2875_v53 }
 0x5cd   : > { %1857 = vmatpush.bf16.msrb.mxu2 %v2888_v0  ;;  %1830 = vmatpush.bf16.msrb.mxu0 %v2864_v7  ;;  %v3263_v0 = vld [vmem:[%s3867_s3 + $0xf0] sm:$0xff] }
 0x5ce   : > { %1815 = vmatpush.bf16.msra.mxu3 %v2876_v56  ;;  %1845 = vmatpush.bf16.msrb.mxu1 %v2852_v25  ;;  %v3256_v56 = vld [vmem:[%s3867_s3 + $0xb8] sm:$0xff]  ;;  %v3243_v7 = vld [vmem:[%s3867_s3 + $0x50] sm:$0xff] }
 0x5d1   : > { %1858 = vmatpush.bf16.msrb.mxu2 %v2872_v16  ;;  %1831 = vmatpush.bf16.msrb.mxu0 %v2848_v21  ;;  %v3250_v16 = vld [vmem:[%s3867_s3 + $0x88] sm:$0xff]  ;;  %v1643_v21 = vperm.slane %v4128_v13, 1 }
 0x5d2   : > { %1816 = vmatpush.bf16.msra.mxu3 %v2860_v4  ;;  %2230 = vmatpush.bf16.msra.mxu1 %v3256_v56  ;;  %v3262_v4 = vld [vmem:[%s3867_s3 + $0xe8] sm:$0xff] }
 0x5d5   : > { %1859 = vmatpush.bf16.msrb.mxu2 %v2856_v27 }
 0x5d6   : > { %1817 = vmatpush.bf16.msra.mxu3 %v2844_v20  ;;  %2231 = vmatpush.bf16.msra.mxu1 %v3255_v58  ;;  %v3249_v20 = vld [vmem:[%s3867_s3 + $0x80] sm:$0xff] }
 0x5d9   : > { %2244 = vmatpush.bf16.msra.mxu2 %v3264_v60 }
 0x5da   : > { %2202 = vmatpush.bf16.msrb.mxu3 %v3240_v59  ;;  %2232 = vmatpush.bf16.msra.mxu1 %v3254_v62 }
 0x5dd   : > { %2245 = vmatpush.bf16.msra.mxu2 %v3263_v0 }
 0x5de   : > { %2203 = vmatpush.bf16.msrb.mxu3 %v3239_v63  ;;  %2233 = vmatpush.bf16.msra.mxu1 %v3253_v2 }
 0x5e1   : > { %2246 = vmatpush.bf16.msra.mxu2 %v3262_v4 }
 0x5e2   : > { %2204 = vmatpush.bf16.msrb.mxu3 %v3238_v3  ;;  %2234 = vmatpush.bf16.msra.mxu1 %v3252_v6 }
 0x5e6   : > { %2205 = vmatpush.bf16.msrb.mxu3 %v3237_v8  ;;  %2235 = vmatpush.bf16.msra.mxu1 %v3251_v10 }
 0x5ea   : > { %2206 = vmatpush.bf16.msrb.mxu3 %v3236_v11  ;;  %2236 = vmatpush.bf16.msra.mxu1 %v3250_v16 }
 0x5ee   : > { %2207 = vmatpush.bf16.msrb.mxu3 %v3235_v17  ;;  %2237 = vmatpush.bf16.msra.mxu1 %v3249_v20 }
 0x5f2   : > { %2208 = vmatpush.bf16.msrb.mxu3 %v3234_v23 }
 0x636   : > { %v1568_v9 = vpop.xlane.xlu2 %1567 }
 0x637   : > { %v1571_v14 = vmul.f32 %v1568_v9, %v4009_v28  ;;  %v3261_v9 = vld [vmem:[%s3867_s3 + $0xe0] sm:$0xff] }
 0x638   : > { %2247 = vmatpush.bf16.msra.mxu2 %v3261_v9 }
 0x639   : > { %v1573_v15 = vadd.f32 1e-12, %v1571_v14  ;;  %v3242_v14 = vld [vmem:[%s3867_s3 + $0x48] sm:$0xff] }
 0x63b   : > { %3382 = vrsqrt.f32 %v1573_v15  ;;  %vm1581_vm9 = vweird.f32 %v1573_v15 }
 0x63c   : > { %2248 = vmatpush.bf16.msra.mxu2 %v3260_v12 }
 0x63e   : > { %v1570_v30 = vpop.xlane.xlu1 %1569 }
 0x63f   : > { %v1572_v31 = vmul.f32 %v1570_v30, %v4009_v28 }
 0x640   : > { %2249 = vmatpush.bf16.msra.mxu2 %v3259_v18 }
 0x641   : > { %v3383_v33 = vpop.eup %3382  ;;  %v1574_v34 = vadd.f32 1e-12, %v1572_v31  ;;  %v1642_v31 = vperm.slane %v4128_v13, 0 }
 0x642   : > { %v1576_v35 = vmul.f32 %v3383_v33, %v1573_v15  ;;  %vm1582_vm8 = vweird.f32 %v3383_v33 }
 0x643   : > { %3384 = vrsqrt.f32 %v1574_v34  ;;  %vm1583_vm13 = vmor %vm1581_vm9, %vm1582_vm8  ;;  %vm1591_vm15 = vweird.f32 %v1574_v34 }
 0x644   : > { %v1577_v36 = vmul.f32 %v3383_v33, %v1576_v35  ;;  %2250 = vmatpush.bf16.msra.mxu2 %v3258_v24 }
 0x646   : > { %v1578_v37 = vmul.f32 0.5, %v1577_v36  ;;  %v1645_v36 = vperm.slane %v4128_v13, 3 }
 0x648   : > { %v1579_v38 = vsub.f32 1.5, %v1578_v37 }
 0x649   : > { %v3385_v39 = vpop.eup %3384 }
 0x64a   : > { %v1580_v41 = vmul.f32 %v3383_v33, %v1579_v38  ;;  %v1586_v42 = vmul.f32 %v3385_v39, %v1574_v34  ;;  %vm1592_vm14 = vweird.f32 %v3385_v39  ;;  %v3257_v34 = vld [vmem:[%s3867_s3 + $0xc0] sm:$0xff] }
 0x64b   : > { %vm1593_vm0 = vmor %vm1591_vm15, %vm1592_vm14  ;;  %2251 = vmatpush.bf16.msra.mxu2 %v3257_v34 }
 0x64c   : > { %v1587_v43 = vmul.f32 %v3385_v39, %v1586_v42  ;;  %v1584_v44 = vsel %vm1583_vm13, %v3383_v33, %v1580_v41  ;;  %v3233_v33 = vld [vmem:[%s3867_s3] sm:$0xff] }
 0x64d   : > { %v1595_v46 = vmul.f32 %v1584_v44, %v4012_v48  ;;  %v3360_v48 = vld [vmem:[%s843_s20] ss:$0 sm:$0xff]  ;;  %2209 = vmatpush.bf16.msrb.mxu3 %v3233_v33 }
 0x64e   : > { %v1588_v45 = vmul.f32 0.5, %v1587_v43 }
 0x64f   : > { %v1600_v50 = vmul.f32 %v3359_v40, %v1595_v46 }
 0x650   : > { %v1589_v32 = vsub.f32 1.5, %v1588_v45 }
 0x651   : > { %v4099_v53 = vadd.f32 %v3360_v48, %v1600_v50 }
 0x652   : > { %v1590_v47 = vmul.f32 %v3385_v39, %v1589_v32 }
 0x654   : > { %v1594_v29 = vsel %vm1593_vm0, %v3385_v39, %v1590_v47 }
 0x655   : > { %v1596_v49 = vmul.f32 %v1594_v29, %v4017_v52  ;;  %v3248_v52 = vld [vmem:[%s3867_s3 + $0x78] sm:$0xff]  ;;  %s4339_s3 = sld [smem:[#allocation31_spill]] (!%p3097_p10) }
 0x656   : > { %2216 = vmatpush.bf16.msra.mxu0 %v3248_v52 }
 0x657   : > { %v1601_v51 = vmul.f32 %v3359_v40, %v1596_v49 }
 0x659   : > { %v4101_v54 = vadd.f32 %v3360_v48, %v1601_v51 }
 0x65a   : > { %2217 = vmatpush.bf16.msra.mxu0 %v3247_v57 }
 0x65b   : > { %v1607_v55 = vpack.c.bf16 %v4101_v54, %v4099_v53 }
 0x65d   : > { %1818 = vmatmul.bf16.vlgmr.msra.gmra.mxu3 %v1607_v55  ;;  %1832 = vmatmul.bf16.vlgmr.msrb.gmra.mxu0 %v1607_v55 }
 0x65e   : > { %1846 = vmatmul.bf16.vlgmr.msrb.gmra.mxu1 %v1607_v55  ;;  %1860 = vmatmul.bf16.vlgmr.msrb.gmra.mxu2 %v1607_v55 }
 0x65f   : > { %2218 = vmatpush.bf16.msra.mxu0 %v3246_v61 }
 0x663   : > { %2219 = vmatpush.bf16.msra.mxu0 %v3245_v1 }
 0x667   : > { %2220 = vmatpush.bf16.msra.mxu0 %v3244_v5 }
 0x66b   : > { %2221 = vmatpush.bf16.msra.mxu0 %v3243_v7 }
 0x66f   : > { %2222 = vmatpush.bf16.msra.mxu0 %v3242_v14 }
 0x673   : > { %2223 = vmatpush.bf16.msra.mxu0 %v3241_v19 }
 0x6da   : > { %v1833_v15 = vpop.f32.mrf.mxu0 }
 0x6db   : > { %v4140_v25 = vadd.f32 %v1833_v15, %v1643_v21  ;;  %v1847_v26 = vpop.f32.mrf.mxu1 }
 0x6dc   : > { %v4142_v27 = vadd.f32 %v1847_v26, %v1644_v22 }
 0x6dd   : > { %v1875_v30 = vmul.f32 0.044715, %v4140_v25  ;;  %v1867_v34 = vmul.f32 0.5, %v4140_v25 }
 0x6de   : > { %v1876_v35 = vmul.f32 0.044715, %v4142_v27 }
 0x6df   : > { %v1883_v37 = vmul.f32 %v1875_v30, %v4140_v25 }
 0x6e0   : > { %v1884_v38 = vmul.f32 %v1876_v35, %v4142_v27  ;;  %v1819_v39 = vpop.f32.mrf.mxu3 }
 0x6e1   : > { %v1891_v41 = vmul.f32 %v1883_v37, %v4140_v25  ;;  %v4153_v42 = vadd.f32 %v1819_v39, %v1642_v31  ;;  %v1861_v43 = vpop.f32.mrf.mxu2 }
 0x6e2   : > { %v1892_v44 = vmul.f32 %v1884_v38, %v4142_v27  ;;  %v4156_v45 = vadd.f32 %v1861_v43, %v1645_v36  ;;  %v1835_v32 = vpop.f32.mrf.mxu0  ;;  %v1868_v38 = vmul.f32 0.5, %v4142_v27 }
 0x6e3   : > { %v1899_v46 = vadd.f32 %v1891_v41, %v4140_v25  ;;  %v1874_v40 = vmul.f32 0.044715, %v4153_v42  ;;  %v1836_v47 = vadd.f32 %v1835_v32, %v1643_v21  ;;  %v1849_v29 = vpop.f32.mrf.mxu1  ;;  %v1866_v25 = vmul.f32 0.5, %v4153_v42 }
 0x6e4   : > { %v1900_v49 = vadd.f32 %v1892_v44, %v4142_v27  ;;  %v1877_v50 = vmul.f32 0.044715, %v4156_v45  ;;  %v1850_v48 = vadd.f32 %v1849_v29, %v1644_v22  ;;  %v1869_v27 = vmul.f32 0.5, %v4156_v45 }
 0x6e5   : > { %v1882_v51 = vmul.f32 %v1874_v40, %v4153_v42  ;;  %v1879_v55 = vmul.f32 0.044715, %v1836_v47  ;;  %v1907_v57 = vmul.f32 0.7978846, %v1899_v46  ;;  %v1871_v35 = vmul.f32 0.5, %v1836_v47 }
 0x6e6   : > { %v1885_v52 = vmul.f32 %v1877_v50, %v4156_v45  ;;  %v1880_v56 = vmul.f32 0.044715, %v1850_v48  ;;  %v1908_v60 = vmul.f32 0.7978846, %v1900_v49  ;;  %v1872_v39 = vmul.f32 0.5, %v1850_v48 }
 0x6e7   : > { %v1890_v58 = vmul.f32 %v1882_v51, %v4153_v42  ;;  %v1887_v59 = vmul.f32 %v1879_v55, %v1836_v47  ;;  %3386 = vtanh.f32 %v1907_v57 }
 0x6e8   : > { %v1893_v61 = vmul.f32 %v1885_v52, %v4156_v45  ;;  %v1888_v62 = vmul.f32 %v1880_v56, %v1850_v48  ;;  %v1821_v63 = vpop.f32.mrf.mxu3  ;;  %3388 = vtanh.f32 %v1908_v60 }
 0x6e9   : > { %v1898_v0 = vadd.f32 %v1890_v58, %v4153_v42  ;;  %v1895_v1 = vmul.f32 %v1887_v59, %v1836_v47  ;;  %v1822_v2 = vadd.f32 %v1821_v63, %v1642_v31  ;;  %v1863_v3 = vpop.f32.mrf.mxu2  ;;  %v3361_v42 = vld [vmem:[%s850_s0] ss:$0 sm:$0xff] }
 0x6ea   : > { %v1901_v4 = vadd.f32 %v1893_v61, %v4156_v45  ;;  %v1896_v5 = vmul.f32 %v1888_v62, %v1850_v48  ;;  %v1864_v6 = vadd.f32 %v1863_v3, %v1645_v36 }
 0x6eb   : > { %v1903_v8 = vadd.f32 %v1895_v1, %v1836_v47  ;;  %v1878_v9 = vmul.f32 0.044715, %v1822_v2  ;;  %v1906_v11 = vmul.f32 0.7978846, %v1898_v0  ;;  %v1870_v47 = vmul.f32 0.5, %v1822_v2 }
 0x6ec   : > { %v1904_v7 = vadd.f32 %v1896_v5, %v1850_v48  ;;  %v1881_v10 = vmul.f32 0.044715, %v1864_v6  ;;  %v1909_v14 = vmul.f32 0.7978846, %v1901_v4  ;;  %v1873_v48 = vmul.f32 0.5, %v1864_v6 }
 0x6ed   : > { %v1911_v12 = vmul.f32 0.7978846, %v1903_v8  ;;  %v1886_v13 = vmul.f32 %v1878_v9, %v1822_v2  ;;  %v3387_v20 = vpop.eup %3386 }
 0x6ee   : > { %v1912_v16 = vmul.f32 0.7978846, %v1904_v7  ;;  %v1889_v17 = vmul.f32 %v1881_v10, %v1864_v6  ;;  %v3389_v22 = vpop.eup %3388  ;;  %v1923_v26 = vadd.f32 1.0, %v3387_v20 }
 0x6ef   : > { %v1894_v18 = vmul.f32 %v1886_v13, %v1822_v2  ;;  %3390 = vtanh.f32 %v1911_v12  ;;  %v1924_v31 = vadd.f32 1.0, %v3389_v22 }
 0x6f0   : > { %v1897_v19 = vmul.f32 %v1889_v17, %v1864_v6  ;;  %3392 = vtanh.f32 %v1912_v16  ;;  %v1931_v44 = vmul.f32 %v1923_v26, %v1867_v34 }
 0x6f1   : > { %v1902_v21 = vadd.f32 %v1894_v18, %v1822_v2  ;;  %3394 = vtanh.f32 %v1906_v11  ;;  %v1932_v46 = vmul.f32 %v1924_v31, %v1868_v38 }
 0x6f2   : > { %v1905_v23 = vadd.f32 %v1897_v19, %v1864_v6  ;;  %3396 = vtanh.f32 %v1909_v14 }
 0x6f3   : > { %v1910_v24 = vmul.f32 0.7978846, %v1902_v21 }
 0x6f4   : > { %v1913_v15 = vmul.f32 0.7978846, %v1905_v23 }
 0x6f5   : > { %v3391_v30 = vpop.eup %3390  ;;  %3398 = vtanh.f32 %v1910_v24 }
 0x6f6   : > { %v3393_v33 = vpop.eup %3392  ;;  %v1927_v36 = vadd.f32 1.0, %v3391_v30  ;;  %3400 = vtanh.f32 %v1913_v15 }
 0x6f7   : > { %v3395_v37 = vpop.eup %3394  ;;  %v1928_v41 = vadd.f32 1.0, %v3393_v33 }
 0x6f8   : > { %v3397_v43 = vpop.eup %3396  ;;  %v1935_v32 = vmul.f32 %v1927_v36, %v1871_v35  ;;  %v1922_v49 = vadd.f32 1.0, %v3395_v37 }
 0x6f9   : > { %v1936_v40 = vmul.f32 %v1928_v41, %v1872_v39  ;;  %v1925_v55 = vadd.f32 1.0, %v3397_v43 }
 0x6fa   : > { %v1939_v29 = vpack.c.bf16 %v1935_v32, %v1931_v44  ;;  %v1930_v58 = vmul.f32 %v1922_v49, %v1866_v25  ;;  %v3362_v44 = vld [vmem:[%s853_s12] ss:$0 sm:$0xff] }
 0x6fb   : > { %v3399_v50 = vpop.eup %3398  ;;  %v1940_v51 = vpack.c.bf16 %v1936_v40, %v1932_v46  ;;  %v1933_v60 = vmul.f32 %v1925_v55, %v1869_v27  ;;  %v3363_v46 = vld [vmem:[%s856_s25] ss:$0 sm:$0xff] }
 0x6fc   : > { %v3401_v52 = vpop.eup %3400  ;;  %2224 = vmatmul.bf16.vlgmr.msra.gmra.mxu0 %v1939_v29  ;;  %v1926_v56 = vadd.f32 1.0, %v3399_v50 }
 0x6fd   : > { %2238 = vmatmul.bf16.vlgmr.msra.gmra.mxu1 %v1940_v51  ;;  %v1929_v57 = vadd.f32 1.0, %v3401_v52 }
 0x6fe   : > { %v1934_v59 = vmul.f32 %v1926_v56, %v1870_v47 }
 0x6ff   : > { %v1937_v61 = vmul.f32 %v1929_v57, %v1873_v48 }
 0x700   : > { %v1938_v62 = vpack.c.bf16 %v1934_v59, %v1930_v58 }
 0x701   : > { %v1941_v63 = vpack.c.bf16 %v1937_v61, %v1933_v60 }
 0x702   : > { %2210 = vmatmul.bf16.vlgmr.msrb.gmra.mxu3 %v1938_v62 }
 0x703   : > { %2252 = vmatmul.bf16.vlgmr.msra.gmra.mxu2 %v1941_v63 }
 0x779   : > { %v2225_v0 = vpop.f32.mrf.mxu0 }
 0x77a   : > { %v2239_v3 = vpop.f32.mrf.mxu1 }
 0x781   : > { %v2227_v10 = vpop.f32.mrf.mxu0 }
 0x782   : > { %v2241_v12 = vpop.f32.mrf.mxu1 }
 0x785   : > { %v2211_v1 = vpop.f32.mrf.mxu3 }
 0x786   : > { %v2212_v2 = vadd.f32 %v3361_v42, %v2211_v1  ;;  %v2253_v4 = vpop.f32.mrf.mxu2 }
 0x788   : > { %v2226_v45 = vadd.f32 %v2225_v0, %v2212_v2 }
 0x78a   : > { %v2240_v5 = vadd.f32 %v2239_v3, %v2226_v45 }
 0x78c   : > { %v2254_v6 = vadd.f32 %v2253_v4, %v2240_v5 }
 0x78d   : > { %v2213_v8 = vpop.f32.mrf.mxu3 }
 0x78e   : > { %v2214_v9 = vadd.f32 %v3361_v42, %v2213_v8  ;;  %v2258_v7 = vadd.f32 %v2254_v6, %v4099_v53  ;;  %v2255_v14 = vpop.f32.mrf.mxu2 }
 0x790   : > { %v2228_v11 = vadd.f32 %v2227_v10, %v2214_v9  ;;  %2262 = vadd.xlane.f32.xlu0 %v2258_v7 }
 0x792   : > { %v2242_v13 = vadd.f32 %v2241_v12, %v2228_v11 }
 0x794   : > { %v2256_v16 = vadd.f32 %v2255_v14, %v2242_v13 }
 0x796   : > { %v2259_v17 = vadd.f32 %v2256_v16, %v4101_v54 }
 0x798   : > { %2264 = vadd.xlane.f32.xlu1 %v2259_v17 }
 0x803   : > { %v2263_v18 = vpop.xlane.xlu0 %2262 }
 0x804   : > { %v2266_v19 = vmul.f32 %v2263_v18, %v4009_v28 }
 0x806   : > { %v2268_v20 = vsub.f32 %v2258_v7, %v2266_v19 }
 0x808   : > { %v2270_v21 = vmul.f32 %v2268_v20, %v2268_v20 }
 0x80a   : > { %2272 = vadd.xlane.f32.xlu1 %v2270_v21 }
 0x80b   : > { %v2265_v22 = vpop.xlane.xlu1 %2264 }
 0x80c   : > { %v2267_v23 = vmul.f32 %v2265_v22, %v4009_v28 }
 0x80e   : > { %v2269_v53 = vsub.f32 %v2259_v17, %v2267_v23 }
 0x810   : > { %v2271_v24 = vmul.f32 %v2269_v53, %v2269_v53 }
 0x812   : > { %2274 = vadd.xlane.f32.xlu1 %v2271_v24 }
 0x87d   : > { %v2273_v15 = vpop.xlane.xlu1 %2272 }
 0x87e   : > { %v2276_v26 = vmul.f32 %v2273_v15, %v4009_v28 }
 0x880   : > { %v2278_v30 = vadd.f32 1e-12, %v2276_v26 }
 0x882   : > { %3402 = vrsqrt.f32 %v2278_v30  ;;  %vm2286_vm2 = vweird.f32 %v2278_v30 }
 0x885   : > { %v2275_v54 = vpop.xlane.xlu1 %2274 }
 0x886   : > { %v2277_v31 = vmul.f32 %v2275_v54, %v4009_v28 }
 0x888   : > { %v3403_v33 = vpop.eup %3402  ;;  %v2279_v34 = vadd.f32 1e-12, %v2277_v31 }
 0x889   : > { %v2281_v35 = vmul.f32 %v3403_v33, %v2278_v30  ;;  %vm2287_vm1 = vweird.f32 %v3403_v33 }
 0x88a   : > { %3404 = vrsqrt.f32 %v2279_v34  ;;  %vm2288_vm3 = vmor %vm2286_vm2, %vm2287_vm1  ;;  %vm2296_vm5 = vweird.f32 %v2279_v34 }
 0x88b   : > { %v2282_v36 = vmul.f32 %v3403_v33, %v2281_v35 }
 0x88d   : > { %v2283_v37 = vmul.f32 0.5, %v2282_v36 }
 0x88f   : > { %v2284_v38 = vsub.f32 1.5, %v2283_v37 }
 0x890   : > { %v3405_v39 = vpop.eup %3404 }
 0x891   : > { %v2285_v41 = vmul.f32 %v3403_v33, %v2284_v38  ;;  %v2291_v43 = vmul.f32 %v3405_v39, %v2279_v34  ;;  %vm2297_vm4 = vweird.f32 %v3405_v39 }
 0x892   : > { %vm2298_vm6 = vmor %vm2296_vm5, %vm2297_vm4 }
 0x893   : > { %v2289_v28 = vsel %vm2288_vm3, %v3403_v33, %v2285_v41  ;;  %v2292_v32 = vmul.f32 %v3405_v39, %v2291_v43 }
 0x894   : > { %v2300_v40 = vmul.f32 %v2289_v28, %v2268_v20 }
 0x895   : > { %v2293_v29 = vmul.f32 0.5, %v2292_v32 }
 0x896   : > { %v2305_v49 = vmul.f32 %v3362_v44, %v2300_v40 }
 0x897   : > { %v2294_v50 = vsub.f32 1.5, %v2293_v29 }
 0x898   : > { %v2310_v51 = vadd.f32 %v3363_v46, %v2305_v49 }
 0x899   : > { %v2295_v55 = vmul.f32 %v3405_v39, %v2294_v50 }
 0x89a   : > { %2312 = vst [vmem:[#allocation2] sm:$0xff] %v2310_v51 }
 0x89b   : > { %v2299_v52 = vsel %vm2298_vm6, %v3405_v39, %v2295_v55 }
 0x89c   : > { %v2301_v25 = vmul.f32 %v2299_v52, %v2269_v53 }
 0x89e   : > { %v2306_v47 = vmul.f32 %v3362_v44, %v2301_v25  ;;  %2317 = sbr.rel (%p3097_p10) target bundleno = 2514 (0x9d2), region = 120 }
 0x8a0   : > { %v2311_v56 = vadd.f32 %v3363_v46, %v2306_v47 }
 0x8a2   : > { %2313 = vst [vmem:[#allocation2 + $0x8] sm:$0xff] %v2311_v56 }
 0x8a3   : > { %v3272_v27 = vld [vmem:[%s4336_s16 + $0x38] sm:$0xff]  ;;  %v3271_v48 = vld [vmem:[%s4336_s16 + $0x30] sm:$0xff]  ;;  %v3270_v59 = vld [vmem:[%s4336_s16 + $0x28] sm:$0xff]  ;;  %v2319_v42 = vpack.c.bf16 %v2311_v56, %v2311_v56  ;;  %v2318_v2 = vpack.c.bf16 %v2310_v51, %v2310_v51  ;;  %vm2345_vm10 = vcmask 1041409  }
 0x8a4   : > { %2397 = vmatpush.bf16.msra.mxu0 %v3272_v27  ;;  %v3280_v57 = vld [vmem:[%s4337_s17 + $0x38] sm:$0xff]  ;;  %v3279_v58 = vld [vmem:[%s4337_s17 + $0x30] sm:$0xff]  ;;  %v3278_v60 = vld [vmem:[%s4337_s17 + $0x28] sm:$0xff] }
 0x8a5   : > { %2480 = vmatpush.bf16.msra.mxu1 %v3280_v57  ;;  %v3269_v61 = vld [vmem:[%s4336_s16 + $0x20] sm:$0xff]  ;;  %v3268_v63 = vld [vmem:[%s4336_s16 + $0x18] sm:$0xff]  ;;  %v3267_v1 = vld [vmem:[%s4336_s16 + $0x10] sm:$0xff]  ;;  %v2343_v3 = vunpack.c.l.b16 %v2319_v42  ;;  %v2342_v4 = vunpack.c.l.b16 %v2318_v2 }
 0x8a6   : > { %v3277_v62 = vld [vmem:[%s4337_s17 + $0x20] sm:$0xff]  ;;  %v3276_v0 = vld [vmem:[%s4337_s17 + $0x18] sm:$0xff]  ;;  %v3266_v45 = vld [vmem:[%s4336_s16 + $0x8] sm:$0xff] }
 0x8a7   : > { %v2344_v5 = vrot.slane %v2343_v3, 7  ;;  %v3265_v6 = vld [vmem:[%s4336_s16] sm:$0xff]  ;;  %v3275_v7 = vld [vmem:[%s4337_s17 + $0x10] sm:$0xff]  ;;  %v3274_v10 = vld [vmem:[%s4337_s17 + $0x8] sm:$0xff] }
 0x8a8   : > { %2398 = vmatpush.bf16.msra.mxu0 %v3271_v48  ;;  %v3273_v11 = vld [vmem:[%s4337_s17] sm:$0xff] }
 0x8a9   : > { %2481 = vmatpush.bf16.msra.mxu1 %v3279_v58  ;;  %v2346_v8 = vsel %vm2345_vm10, %v2344_v5, %v2342_v4  ;;  %v3406_v12 = vld [vmem:[%s4338_s5] ss:$0 sm:$0xff] }
 0x8aa   : > { %v2347_v9 = vpack.c.b16 %v2346_v8, %v2346_v8  ;;  %v3407_v19 = vld [vmem:[%s4339_s3] ss:$0 sm:$0xff] }
 0x8ac   : > { %2399 = vmatpush.bf16.msra.mxu0 %v3270_v59 }
 0x8ad   : > { %2482 = vmatpush.bf16.msra.mxu1 %v3278_v60 }
 0x8b0   : > { %2400 = vmatpush.bf16.msra.mxu0 %v3269_v61 }
 0x8b1   : > { %2483 = vmatpush.bf16.msra.mxu1 %v3277_v62 }
 0x8b4   : > { %2401 = vmatpush.bf16.msra.mxu0 %v3268_v63 }
 0x8b5   : > { %2484 = vmatpush.bf16.msra.mxu1 %v3276_v0 }
 0x8b8   : > { %2402 = vmatpush.bf16.msra.mxu0 %v3267_v1 }
 0x8b9   : > { %2485 = vmatpush.bf16.msra.mxu1 %v3275_v7 }
 0x8bc   : > { %2403 = vmatpush.bf16.msra.mxu0 %v3266_v45 }
 0x8bd   : > { %2486 = vmatpush.bf16.msra.mxu1 %v3274_v10 }
 0x8c0   : > { %2404 = vmatpush.bf16.msra.mxu0 %v3265_v6 }
 0x8c1   : > { %2487 = vmatpush.bf16.msra.mxu1 %v3273_v11 }
 0x8c3   : > { %2405 = vmatmul.bf16.vlgmr.msra.gmra.mxu0 %v2347_v9 }
 0x940   : > { %v2406_v13 = vpop.f32.mrf.mxu0 }
 0x941   : > { %v2407_v14 = vadd.f32 %v3406_v12, %v2406_v13 }
 0x943   : > { %3408 = vtanh.f32 %v2407_v14 }
 0x948   : > { %v2408_v16 = vpop.f32.mrf.mxu0 }
 0x949   : > { %v3409_v17 = vpop.eup %3408 }
 0x94a   : > { %v2411_v18 = vpack.c.bf16 %v3409_v17, %v3409_v17 }
 0x94c   : > { %2488 = vmatmul.bf16.vlgmr.msra.gmra.mxu1 %v2411_v18 }
 0x9c9   : > { %v2489_v20 = vpop.f32.mrf.mxu1 }
 0x9ca   : > { %v2490_v21 = vadd.f32 %v3407_v19, %v2489_v20 }
 0x9cc   : > { %2493 = vst [vmem:[#allocation9] sm:$0x3] %v2490_v21 }
 0x9d1   : > { %v2491_v22 = vpop.f32.mrf.mxu1 }
 0x9d2 PF: > { %p3306_p5 = scmp.eq.s32.totalorder %s3706_s2, 1  ;;  %s3581_s0 = smov [#allocation9]  }
 0x9d3   : > { %s2500_s29 = sshll.u32 %s3581_s0, 4  ;;  %s4340_s13 = sld [smem:[#allocation32_spill]]  ;;  %s2501_s29 = int_to_ptr.vmem [resolvable:$true] %s2500_s29 }
 0x9d9   : > { %s2502_s26 = sshll.u32 %s4340_s13, 4  ;;  %s2503_s26 = int_to_ptr.hbm [resolvable:$true] %s2502_s26 }
 0x9da   : > { %3292 = dma.vmem_to_hbm [thread:$0]  (%p3306_p5), %s2501_s29, 32, %s2503_s26, [#allocation5]  }
 0x9db   : > { %3553 = dma.done.wait (%p3306_p5), [#allocation5], 32  }
 0x9dc   : > { %3555 = vsyncadd (%p3306_p5), [#allocation5], 4294967264 }
 0x9dd PF: > { %s4341_s24 = sld [smem:[#allocation14_spill]]  ;;  %s4344_s1 = smov %s3562_s22 }
 0x9de   : > { %s4342_s12 = sld [smem:[#allocation13_spill]] }
 0x9df   : > { %s4343_s23 = sld [smem:[#allocation15_spill]] }
 0x9e3   : > { %p34_p13 = scmp.ge.s32.totalorder %s4341_s24, 4  }
 0x9e4   : > { %s4345_s22 = smov %s4342_s12 }
 0x9e5   :  { %36 = sbr.rel (!%p34_p13) target bundleno = 24 (0x18), region = 196 }
 0x9ea   :  { %2516 = vsyncpa [#allocation4], 1 }
 0x9eb   :  { %2518 = vsyncpa [#allocation4 + $0x1], 1 }
 0x9ec   :  { %2519 = vsyncpa [#allocation7], 1 }
 0x9ed   :  { %2521 = vsyncpa [#allocation7 + $0x1], 1 }
 0x9ee   :  { %2522 = vsyncpa [#allocation5], 1 }
 0x9ef   :  { %2524 = vsyncpa [#allocation5 + $0x1], 1 }

</bundles_post_ra>
